<compile_context>
chip_gen: v6e
topology: v6e:2x2x1
jax: 0.10.0
libtpu: 0.0.40
codegen_flags: <defaults>
</compile_context>

<pallas_src>
import math
from functools import partial

import jax
import jax.numpy as jnp
from jax.experimental import pallas as pl
from jax.experimental.pallas import tpu as pltpu


# ---------------- config (small, consistent with GPTConfig fields) ----------------
class Config:
    vocab_size = 64
    block_size = 16
    n_layer = 2
    n_head = 2
    n_embd = 32


# ---------------- in-kernel helpers ----------------
def _layernorm(z, w, b, eps=1e-5):
    mu = jnp.mean(z, axis=-1, keepdims=True)
    var = jnp.mean((z - mu) ** 2, axis=-1, keepdims=True)
    return (z - mu) * jax.lax.rsqrt(var + eps) * w + b


def _gelu_tanh(x):
    # matches torch.nn.GELU(approximate='tanh')
    return 0.5 * x * (1.0 + jnp.tanh(0.7978845608028654 * (x + 0.044715 * x * x * x)))


# ---------------- Kernel 1: all transformer blocks + final LayerNorm ----------------
def gpt_layers_kernel(x_ref,
                      ln1w_ref, ln1b_ref,
                      wq_ref, bq_ref, wk_ref, bk_ref, wv_ref, bv_ref,
                      wpr_ref, bpr_ref,
                      ln2w_ref, ln2b_ref,
                      wfc_ref, bfc_ref, wf2_ref, bf2_ref,
                      lnfw_ref, lnfb_ref,
                      xf_ref, x_scr, *, n_head):
    """Grid point (b, l) runs transformer block l on batch b's VMEM-resident residual
    stream; the last layer step additionally applies ln_f and emits the final hidden
    states (the lm_head matmul runs in its own tiled kernel)."""
    l = pl.program_id(1)
    bf16 = jnp.bfloat16

    @pl.when(l == 0)
    def _():
        x_scr[...] = x_ref[0]                       # this batch's embeddings, read once

    x = x_scr[...]                                  # (T, C) f32 residual, stays in VMEM
    T, C = x.shape
    H = n_head
    hd = C // H

    # ---- LN1 + per-head QKV projections (head = dot_general batch dim, bf16 operands) ----
    xn = _layernorm(x, ln1w_ref[0, 0], ln1b_ref[0, 0]).astype(bf16)
    xn_h = jnp.broadcast_to(xn, (H, T, C))
    # NOTE: 1/sqrt(hd) is pre-folded into wq / bq (prepare_params).
    q = jnp.einsum('htc,hcd->htd', xn_h, wq_ref[0], preferred_element_type=jnp.float32) + bq_ref[0]
    k = jnp.einsum('htc,hcd->htd', xn_h, wk_ref[0], preferred_element_type=jnp.float32) + bk_ref[0]
    v = jnp.einsum('htc,hcd->htd', xn_h, wv_ref[0], preferred_element_type=jnp.float32) + bv_ref[0]

    # ---- causal self-attention, batched over heads; mask built in-kernel (no O(T^2) DMA) ----
    # TODO(synk): for long T, tile q rows / loop kv flash-style instead of one (H,T,T) score block.
    s = jnp.einsum('hqd,hkd->hqk', q.astype(bf16), k.astype(bf16),
                   preferred_element_type=jnp.float32)
    qpos = jax.lax.broadcasted_iota(jnp.int32, s.shape, 1)
    kpos = jax.lax.broadcasted_iota(jnp.int32, s.shape, 2)
    s = jnp.where(qpos >= kpos, s, -1e30)            # causal mask, f32 scores
    m = jnp.max(s, axis=-1, keepdims=True)
    p = jnp.exp(s - m)                               # softmax arithmetic stays f32
    p = p * pl.reciprocal(jnp.sum(p, axis=-1, keepdims=True), approx=True)
    y = jnp.einsum('hqk,hkd->hqd', p.astype(bf16), v.astype(bf16),
                   preferred_element_type=jnp.float32)          # (H, T, hd)

    # ---- output projection: per-head row blocks of c_proj, summed over heads (== concat @ W) ----
    o = jnp.einsum('htd,hdc->htc', y.astype(bf16), wpr_ref[0],
                   preferred_element_type=jnp.float32)
    x = x + jnp.sum(o, axis=0) + bpr_ref[0, 0]

    # ---- MLP (bf16 operands, f32 accumulation, f32 GELU) ----
    xn2 = _layernorm(x, ln2w_ref[0, 0], ln2b_ref[0, 0])
    h1 = jnp.dot(xn2.astype(bf16), wfc_ref[0], preferred_element_type=jnp.float32) + bfc_ref[0, 0]
    h2 = jnp.dot(_gelu_tanh(h1).astype(bf16), wf2_ref[0],
                 preferred_element_type=jnp.float32) + bf2_ref[0, 0]
    x = x + h2
    x_scr[...] = x                                   # residual never touches HBM mid-network

    # ---- final LayerNorm on the last layer; tied lm_head runs in its own tiled kernel ----
    @pl.when(l == pl.num_programs(1) - 1)
    def _():
        xf_ref[0] = _layernorm(x, lnfw_ref[0], lnfb_ref[0]).astype(xf_ref.dtype)


# ---------------- Kernel 2: lm_head, tiled over (row_tile, vocab_tile) ----------------
def lm_head_kernel(x_ref, w_ref, o_ref):
    o_ref[...] = jnp.dot(x_ref[...], w_ref[...], preferred_element_type=jnp.float32)


# ---------------- parameter prep: stack layers, per-head layout, bf16, pad lm_head ----------------
def prepare_params(params, cfg):
    """One-time (outside the hot path) re-layout of canonical params for the kernels."""
    C, H, V, L = cfg.n_embd, cfg.n_head, cfg.vocab_size, cfg.n_layer
    hd = C // H
    bf16 = jnp.bfloat16

    def stack(name):
        return jnp.stack([lp[name] for lp in params['blocks']], axis=0)

    w_qkv = stack('w_qkv')                           # (L, C, 3C)
    b_qkv = stack('b_qkv')                           # (L, 1, 3C)

    def per_head_w(w):                               # (L, C, C) -> (L, H, C, hd)
        return jnp.transpose(w.reshape(L, C, H, hd), (0, 2, 1, 3))

    def per_head_b(b):                               # (L, 1, C) -> (L, H, 1, hd)
        return jnp.transpose(b.reshape(L, 1, H, hd), (0, 2, 1, 3))

    scale = 1.0 / math.sqrt(hd)                      # folded into q so the kernel never rescales
    wq = per_head_w(w_qkv[:, :, 0 * C:1 * C]) * scale
    wk = per_head_w(w_qkv[:, :, 1 * C:2 * C])
    wv = per_head_w(w_qkv[:, :, 2 * C:3 * C])
    bq = per_head_b(b_qkv[:, :, 0 * C:1 * C]) * scale
    bk = per_head_b(b_qkv[:, :, 1 * C:2 * C])
    bv = per_head_b(b_qkv[:, :, 2 * C:3 * C])

    w_proj3 = stack('w_proj').reshape(L, H, hd, C)   # per-head row blocks of c_proj

    Vp = ((V + 127) // 128) * 128                    # lane-dense lm_head output
    wte_T_pad = jnp.zeros((C, Vp), jnp.float32).at[:, :V].set(params['wte'].T)

    # TODO(synk): at GPT-2 scale on v7x (64 MiB VMEM), additionally tile w_fc / w_fc2 / the
    # QKV weights over K/N with extra grid axes instead of whole-weight-resident blocks.
    return dict(
        wte=params['wte'], wpe=params['wpe'],
        lnf_w=params['lnf_w'], lnf_b=params['lnf_b'],
        wte_T_pad=wte_T_pad.astype(bf16),
        ln1_w=stack('ln1_w'), ln1_b=stack('ln1_b'),
        wq=wq.astype(bf16), bq=bq,
        wk=wk.astype(bf16), bk=bk,
        wv=wv.astype(bf16), bv=bv,
        w_proj=w_proj3.astype(bf16), b_proj=stack('b_proj'),
        ln2_w=stack('ln2_w'), ln2_b=stack('ln2_b'),
        w_fc=stack('w_fc').astype(bf16), b_fc=stack('b_fc'),
        w_fc2=stack('w_fc2').astype(bf16), b_fc2=stack('b_fc2'),
    )


def _pick_tile(n, candidates):
    for c in candidates:
        if n % c == 0:
            return c
    return n


def _nbytes(shape, dtype):
    return int(math.prod(shape)) * jnp.dtype(dtype).itemsize


# ---------------- forward wrapper (two pallas_calls) ----------------
def gpt_forward(idx, prep, cfg):
    """Equivalent of GPT.forward(idx, target=None) -> logits."""
    B, T = idx.shape
    assert T <= cfg.block_size
    C, L, H, V = cfg.n_embd, cfg.n_layer, cfg.n_head, cfg.vocab_size
    Vp = prep['wte_T_pad'].shape[1]
    BT = B * T

    # Embedding gather is plain-JAX glue.
    x = (jnp.take(prep['wte'], idx, axis=0) + prep['wpe'][:T]).astype(jnp.float32)  # (B, T, C)

    layer_args = [prep['ln1_w'], prep['ln1_b'],
                  prep['wq'], prep['bq'], prep['wk'], prep['bk'], prep['wv'], prep['bv'],
                  prep['w_proj'], prep['b_proj'],
                  prep['ln2_w'], prep['ln2_b'],
                  prep['w_fc'], prep['b_fc'], prep['w_fc2'], prep['b_fc2']]
    const_args = [prep['lnf_w'], prep['lnf_b']]

    def layer_spec(a):          # indexed along the stacked layer axis
        return pl.BlockSpec((1,) + a.shape[1:],
                            lambda b, l, nd=a.ndim - 1: (l,) + (0,) * nd)

    def const_spec(a):          # fetched once, VMEM-resident
        return pl.BlockSpec(a.shape, lambda b, l, nd=a.ndim: (0,) * nd)

    batch_spec = pl.BlockSpec((1, T, C), lambda b, l: (b, 0, 0))

    # Explicit scoped-VMEM budget: resident blocks + double-buffered per-layer weights.
    per_layer = sum(_nbytes(a.shape[1:], a.dtype) for a in layer_args)
    resident = (2 * _nbytes((T, C), jnp.float32) + _nbytes((T, C), jnp.bfloat16)
                + sum(_nbytes(a.shape, a.dtype) for a in const_args))
    vmem1 = int(max(32 << 20, 2 * (2 * per_layer + resident)))

    # TODO(synk): grid=(B, L) refetches layer weights once per batch; for very large B with
    # GPT-2-scale weights, fold batch back into rows and tile rows inside the layer step instead.
    xf = pl.pallas_call(
        partial(gpt_layers_kernel, n_head=H),
        grid=(B, L),
        in_specs=[batch_spec] + [layer_spec(a) for a in layer_args]
                 + [const_spec(a) for a in const_args],
        out_specs=pl.BlockSpec((1, T, C), lambda b, l: (b, 0, 0)),
        out_shape=jax.ShapeDtypeStruct((B, T, C), jnp.bfloat16),
        scratch_shapes=[pltpu.VMEM((T, C), jnp.float32)],       # persistent residual stream
        compiler_params=pltpu.CompilerParams(
            dimension_semantics=("parallel", "arbitrary"),
            vmem_limit_bytes=vmem1),
    )(x, *layer_args, *const_args)

    # ---- lm_head: separate kernel, tiled (row_tile, vocab_tile), both axes parallel ----
    xf2 = xf.reshape(BT, C)
    tm = _pick_tile(BT, (256, 128, 64, 32, 16, 8))
    tv = _pick_tile(Vp, (512, 256, 128))
    vmem2 = int(max(32 << 20,
                    4 * (_nbytes((tm, C), jnp.bfloat16) + _nbytes((C, tv), jnp.bfloat16)
                         + _nbytes((tm, tv), jnp.float32))))
    logits_pad = pl.pallas_call(
        lm_head_kernel,
        grid=(BT // tm, Vp // tv),
        in_specs=[pl.BlockSpec((tm, C), lambda i, j: (i, 0)),
                  pl.BlockSpec((C, tv), lambda i, j: (0, j))],
        out_specs=pl.BlockSpec((tm, tv), lambda i, j: (i, j)),
        out_shape=jax.ShapeDtypeStruct((BT, Vp), jnp.float32),
        compiler_params=pltpu.CompilerParams(
            dimension_semantics=("parallel", "parallel"),
            vmem_limit_bytes=vmem2),
    )(xf2, prep['wte_T_pad'])

    # TODO(synk): cross-entropy loss path (target is not None) left to plain-JAX callers.
    return logits_pad[:, :V].reshape(B, T, V)


# ---------------- deterministic parameter init (canonical layout) ----------------
def init_params(key, cfg):
    C, V, L = cfg.n_embd, cfg.vocab_size, cfg.n_layer
    std = 0.02
    keys = iter(jax.random.split(key, 2 + 4 * L))
    p = {
        'wte': jax.random.normal(next(keys), (V, C), jnp.float32) * std,
        'wpe': jax.random.normal(next(keys), (cfg.block_size, C), jnp.float32) * std,
        'lnf_w': jnp.ones((1, C), jnp.float32),
        'lnf_b': jnp.zeros((1, C), jnp.float32),
    }
    blocks = []
    for _ in range(L):
        blocks.append(dict(
            ln1_w=jnp.ones((1, C), jnp.float32),
            ln1_b=jnp.zeros((1, C), jnp.float32),
            w_qkv=jax.random.normal(next(keys), (C, 3 * C), jnp.float32) * std,
            b_qkv=jnp.zeros((1, 3 * C), jnp.float32),
            w_proj=jax.random.normal(next(keys), (C, C), jnp.float32) * std,
            b_proj=jnp.zeros((1, C), jnp.float32),
            ln2_w=jnp.ones((1, C), jnp.float32),
            ln2_b=jnp.zeros((1, C), jnp.float32),
            w_fc=jax.random.normal(next(keys), (C, 4 * C), jnp.float32) * std,
            b_fc=jnp.zeros((1, 4 * C), jnp.float32),
            w_fc2=jax.random.normal(next(keys), (4 * C, C), jnp.float32) * std,
            b_fc2=jnp.zeros((1, C), jnp.float32),
        ))
    p['blocks'] = blocks
    return p


# ---------------- pure-JAX f32 reference for correctness check ----------------
def reference_forward(idx, params, cfg):
    def ln(z, w, b):
        mu = z.mean(-1, keepdims=True)
        var = ((z - mu) ** 2).mean(-1, keepdims=True)
        return (z - mu) / jnp.sqrt(var + 1e-5) * w[0] + b[0]

    B, T = idx.shape
    C, H = cfg.n_embd, cfg.n_head
    hd = C // H
    x = jnp.take(params['wte'], idx, axis=0) + params['wpe'][:T]
    mask = jnp.tril(jnp.ones((T, T), bool))
    for lp in params['blocks']:
        xn = ln(x, lp['ln1_w'], lp['ln1_b'])
        qkv = xn @ lp['w_qkv'] + lp['b_qkv'][0]
        q, k, v = jnp.split(qkv, 3, axis=-1)
        q = q.reshape(B, T, H, hd).transpose(0, 2, 1, 3)
        k = k.reshape(B, T, H, hd).transpose(0, 2, 1, 3)
        v = v.reshape(B, T, H, hd).transpose(0, 2, 1, 3)
        s = jnp.einsum('bhqd,bhkd->bhqk', q, k) / math.sqrt(hd)
        s = jnp.where(mask, s, -jnp.inf)
        att = jax.nn.softmax(s, axis=-1)
        y = jnp.einsum('bhqk,bhkd->bhqd', att, v).transpose(0, 2, 1, 3).reshape(B, T, C)
        x = x + y @ lp['w_proj'] + lp['b_proj'][0]
        xn2 = ln(x, lp['ln2_w'], lp['ln2_b'])
        h1 = xn2 @ lp['w_fc'] + lp['b_fc'][0]
        g = 0.5 * h1 * (1.0 + jnp.tanh(0.7978845608028654 * (h1 + 0.044715 * h1 ** 3)))
        x = x + g @ lp['w_fc2'] + lp['b_fc2'][0]
    x = ln(x, params['lnf_w'], params['lnf_b'])
    return x @ params['wte'].T


# ---------------- main ----------------
if __name__ == "__main__":
    cfg = Config()
    params = init_params(jax.random.PRNGKey(0), cfg)
    prep = prepare_params(params, cfg)          # one-time kernel-layout prep (not per-forward)

    B, T = 2, 8
    idx = jax.random.randint(jax.random.PRNGKey(1), (B, T), 0, cfg.vocab_size, dtype=jnp.int32)

    logits = jax.block_until_ready(gpt_forward(idx, prep, cfg))
    ref = reference_forward(idx, params, cfg)

    assert logits.shape == (B, T, cfg.vocab_size), logits.shape
    assert bool(jnp.all(jnp.isfinite(logits)))
    # bf16 matmul operands (f32 accumulation) -> compare against the f32 reference
    # with a bf16-appropriate tolerance.
    assert bool(jnp.allclose(logits, ref, rtol=2e-2, atol=2e-2)), \
        float(jnp.max(jnp.abs(logits - ref)))
    print("KERNEL_OK")
</pallas_src>

<mosaic_0001>
module attributes {stable_mosaic.version = 11 : i64} {
  func.func @gpt_layers_kernel(%arg0: i32, %arg1: i32, %arg2: memref<1x8x32xf32, #tpu.memory_space<vmem>>, %arg3: memref<1x1x32xf32, #tpu.memory_space<vmem>>, %arg4: memref<1x1x32xf32, #tpu.memory_space<vmem>>, %arg5: memref<1x2x32x16xbf16, #tpu.memory_space<vmem>>, %arg6: memref<1x2x1x16xf32, #tpu.memory_space<vmem>>, %arg7: memref<1x2x32x16xbf16, #tpu.memory_space<vmem>>, %arg8: memref<1x2x1x16xf32, #tpu.memory_space<vmem>>, %arg9: memref<1x2x32x16xbf16, #tpu.memory_space<vmem>>, %arg10: memref<1x2x1x16xf32, #tpu.memory_space<vmem>>, %arg11: memref<1x2x16x32xbf16, #tpu.memory_space<vmem>>, %arg12: memref<1x1x32xf32, #tpu.memory_space<vmem>>, %arg13: memref<1x1x32xf32, #tpu.memory_space<vmem>>, %arg14: memref<1x1x32xf32, #tpu.memory_space<vmem>>, %arg15: memref<1x32x128xbf16, #tpu.memory_space<vmem>>, %arg16: memref<1x1x128xf32, #tpu.memory_space<vmem>>, %arg17: memref<1x128x32xbf16, #tpu.memory_space<vmem>>, %arg18: memref<1x1x32xf32, #tpu.memory_space<vmem>>, %arg19: memref<1x32xf32, #tpu.memory_space<vmem>>, %arg20: memref<1x32xf32, #tpu.memory_space<vmem>>, %arg21: memref<1x8x32xbf16, #tpu.memory_space<vmem>>, %arg22: memref<8x32xf32, #tpu.memory_space<vmem>>) attributes {dimension_semantics = [#tpu.dimension_semantics<parallel>, #tpu.dimension_semantics<arbitrary>], iteration_bounds = array<i64: 2, 2>, scalar_prefetch = 0 : i64, scratch_operands = 1 : i64, tpu.core_type = #tpu.core_type<tc>, window_params = [{transform_indices = @transform_0, window_bounds = array<i64: 1, 8, 32>}, {transform_indices = @transform_1, window_bounds = array<i64: 1, 1, 32>}, {transform_indices = @transform_2, window_bounds = array<i64: 1, 1, 32>}, {transform_indices = @transform_3, window_bounds = array<i64: 1, 2, 32, 16>}, {transform_indices = @transform_4, window_bounds = array<i64: 1, 2, 1, 16>}, {transform_indices = @transform_5, window_bounds = array<i64: 1, 2, 32, 16>}, {transform_indices = @transform_6, window_bounds = array<i64: 1, 2, 1, 16>}, {transform_indices = @transform_7, window_bounds = array<i64: 1, 2, 32, 16>}, {transform_indices = @transform_8, window_bounds = array<i64: 1, 2, 1, 16>}, {transform_indices = @transform_9, window_bounds = array<i64: 1, 2, 16, 32>}, {transform_indices = @transform_10, window_bounds = array<i64: 1, 1, 32>}, {transform_indices = @transform_11, window_bounds = array<i64: 1, 1, 32>}, {transform_indices = @transform_12, window_bounds = array<i64: 1, 1, 32>}, {transform_indices = @transform_13, window_bounds = array<i64: 1, 32, 128>}, {transform_indices = @transform_14, window_bounds = array<i64: 1, 1, 128>}, {transform_indices = @transform_15, window_bounds = array<i64: 1, 128, 32>}, {transform_indices = @transform_16, window_bounds = array<i64: 1, 1, 32>}, {pipeline_mode = #tpu.pipeline_mode<synchronous>, transform_indices = @transform_17, window_bounds = array<i64: 1, 32>}, {pipeline_mode = #tpu.pipeline_mode<synchronous>, transform_indices = @transform_18, window_bounds = array<i64: 1, 32>}, {transform_indices = @transform_19, window_bounds = array<i64: 1, 8, 32>}]} {
    %c0_i32 = arith.constant 0 : i32
    %0 = arith.cmpi eq, %arg1, %c0_i32 : i32
    %1 = arith.extui %0 : i1 to i32
    %c0_i32_0 = arith.constant 0 : i32
    %2 = arith.cmpi ne, %1, %c0_i32_0 : i32
    scf.if %2 {
      %c0_85 = arith.constant 0 : index
      %c0_86 = arith.constant 0 : index
      %c0_87 = arith.constant 0 : index
      %152 = vector.load %arg2[%c0_85, %c0_86, %c0_87] : memref<1x8x32xf32, #tpu.memory_space<vmem>>, vector<1x8x32xf32>
      %153 = vector.shape_cast %152 : vector<1x8x32xf32> to vector<8x32xf32>
      %c0_88 = arith.constant 0 : index
      %c0_89 = arith.constant 0 : index
      %154 = vector.load %arg22[%c0_88, %c0_89] : memref<8x32xf32, #tpu.memory_space<vmem>>, vector<8x32xf32>
      tpu.vector_store %arg22[%c0_88, %c0_89], %153 {strides = array<i32>} : memref<8x32xf32, #tpu.memory_space<vmem>>, vector<8x32xf32>,
    } else {
    }
    %c0 = arith.constant 0 : index
    %c0_1 = arith.constant 0 : index
    %3 = vector.load %arg22[%c0, %c0_1] : memref<8x32xf32, #tpu.memory_space<vmem>>, vector<8x32xf32>
    %c0_2 = arith.constant 0 : index
    %c0_3 = arith.constant 0 : index
    %c0_4 = arith.constant 0 : index
    %4 = vector.load %arg3[%c0_2, %c0_3, %c0_4] : memref<1x1x32xf32, #tpu.memory_space<vmem>>, vector<1x1x32xf32>
    %5 = vector.shape_cast %4 : vector<1x1x32xf32> to vector<32xf32>
    %c0_5 = arith.constant 0 : index
    %c0_6 = arith.constant 0 : index
    %c0_7 = arith.constant 0 : index
    %6 = vector.load %arg4[%c0_5, %c0_6, %c0_7] : memref<1x1x32xf32, #tpu.memory_space<vmem>>, vector<1x1x32xf32>
    %7 = vector.shape_cast %6 : vector<1x1x32xf32> to vector<32xf32>
    %cst = arith.constant dense<0.000000e+00> : vector<8xf32>
    %8 = vector.multi_reduction <add>, %3, %cst [1] : vector<8x32xf32> to vector<8xf32>
    %9 = vector.shape_cast %8 : vector<8xf32> to vector<8x1xf32>
    %cst_8 = arith.constant 3.200000e+01 : f32
    %10 = vector.broadcast %cst_8 : f32 to vector<8x1xf32>
    %11 = arith.divf %9, %10 : vector<8x1xf32>
    %12 = vector.broadcast %11 : vector<8x1xf32> to vector<8x32xf32>
    %13 = arith.subf %3, %12 : vector<8x32xf32>
    %14 = arith.mulf %13, %13 : vector<8x32xf32>
    %cst_9 = arith.constant dense<0.000000e+00> : vector<8xf32>
    %15 = vector.multi_reduction <add>, %14, %cst_9 [1] : vector<8x32xf32> to vector<8xf32>
    %16 = vector.shape_cast %15 : vector<8xf32> to vector<8x1xf32>
    %cst_10 = arith.constant 3.200000e+01 : f32
    %17 = vector.broadcast %cst_10 : f32 to vector<8x1xf32>
    %18 = arith.divf %16, %17 : vector<8x1xf32>
    %19 = vector.broadcast %11 : vector<8x1xf32> to vector<8x32xf32>
    %20 = arith.subf %3, %19 : vector<8x32xf32>
    %cst_11 = arith.constant 9.99999974E-6 : f32
    %21 = vector.broadcast %cst_11 : f32 to vector<8x1xf32>
    %22 = arith.addf %18, %21 : vector<8x1xf32>
    %23 = math.rsqrt %22 : vector<8x1xf32>
    %24 = vector.broadcast %23 : vector<8x1xf32> to vector<8x32xf32>
    %25 = arith.mulf %20, %24 : vector<8x32xf32>
    %26 = vector.shape_cast %5 : vector<32xf32> to vector<1x32xf32>
    %27 = vector.broadcast %26 : vector<1x32xf32> to vector<8x32xf32>
    %28 = arith.mulf %25, %27 : vector<8x32xf32>
    %29 = vector.shape_cast %7 : vector<32xf32> to vector<1x32xf32>
    %30 = vector.broadcast %29 : vector<1x32xf32> to vector<8x32xf32>
    %31 = arith.addf %28, %30 : vector<8x32xf32>
    %32 = arith.truncf %31 : vector<8x32xf32> to vector<8x32xbf16>
    %33 = vector.shape_cast %32 : vector<8x32xbf16> to vector<1x8x32xbf16>
    %34 = vector.broadcast %33 : vector<1x8x32xbf16> to vector<2x8x32xbf16>
    %c0_12 = arith.constant 0 : index
    %c0_13 = arith.constant 0 : index
    %c0_14 = arith.constant 0 : index
    %c0_15 = arith.constant 0 : index
    %35 = vector.load %arg5[%c0_12, %c0_13, %c0_14, %c0_15] : memref<1x2x32x16xbf16, #tpu.memory_space<vmem>>, vector<1x2x32x16xbf16>
    %36 = vector.shape_cast %35 : vector<1x2x32x16xbf16> to vector<2x32x16xbf16>
    "tpu.trace_start"() <{level = 10 : i32, message = "htc,hcd->htd"}> : () -> ()
    %cst_16 = arith.constant dense<0.000000e+00> : vector<2x8x16xf32>
    %37 = tpu.matmul %34, %36, %cst_16 {dimension_numbers = #tpu.dot_dimension_numbers<[2], [1], [1], [2], [0, 0, 0, 1, 1, 2], [0], [0]>} : vector<2x8x32xbf16>, vector<2x32x16xbf16>, vector<2x8x16xf32> -> vector<2x8x16xf32>
    "tpu.trace_stop"() : () -> ()
    %c0_17 = arith.constant 0 : index
    %c0_18 = arith.constant 0 : index
    %c0_19 = arith.constant 0 : index
    %c0_20 = arith.constant 0 : index
    %38 = vector.load %arg6[%c0_17, %c0_18, %c0_19, %c0_20] : memref<1x2x1x16xf32, #tpu.memory_space<vmem>>, vector<1x2x1x16xf32>
    %39 = vector.shape_cast %38 : vector<1x2x1x16xf32> to vector<2x1x16xf32>
    %40 = vector.broadcast %39 : vector<2x1x16xf32> to vector<2x8x16xf32>
    %41 = arith.addf %37, %40 : vector<2x8x16xf32>
    %c0_21 = arith.constant 0 : index
    %c0_22 = arith.constant 0 : index
    %c0_23 = arith.constant 0 : index
    %c0_24 = arith.constant 0 : index
    %42 = vector.load %arg7[%c0_21, %c0_22, %c0_23, %c0_24] : memref<1x2x32x16xbf16, #tpu.memory_space<vmem>>, vector<1x2x32x16xbf16>
    %43 = vector.shape_cast %42 : vector<1x2x32x16xbf16> to vector<2x32x16xbf16>
    "tpu.trace_start"() <{level = 10 : i32, message = "htc,hcd->htd"}> : () -> ()
    %cst_25 = arith.constant dense<0.000000e+00> : vector<2x8x16xf32>
    %44 = tpu.matmul %34, %43, %cst_25 {dimension_numbers = #tpu.dot_dimension_numbers<[2], [1], [1], [2], [0, 0, 0, 1, 1, 2], [0], [0]>} : vector<2x8x32xbf16>, vector<2x32x16xbf16>, vector<2x8x16xf32> -> vector<2x8x16xf32>
    "tpu.trace_stop"() : () -> ()
    %c0_26 = arith.constant 0 : index
    %c0_27 = arith.constant 0 : index
    %c0_28 = arith.constant 0 : index
    %c0_29 = arith.constant 0 : index
    %45 = vector.load %arg8[%c0_26, %c0_27, %c0_28, %c0_29] : memref<1x2x1x16xf32, #tpu.memory_space<vmem>>, vector<1x2x1x16xf32>
    %46 = vector.shape_cast %45 : vector<1x2x1x16xf32> to vector<2x1x16xf32>
    %47 = vector.broadcast %46 : vector<2x1x16xf32> to vector<2x8x16xf32>
    %48 = arith.addf %44, %47 : vector<2x8x16xf32>
    %c0_30 = arith.constant 0 : index
    %c0_31 = arith.constant 0 : index
    %c0_32 = arith.constant 0 : index
    %c0_33 = arith.constant 0 : index
    %49 = vector.load %arg9[%c0_30, %c0_31, %c0_32, %c0_33] : memref<1x2x32x16xbf16, #tpu.memory_space<vmem>>, vector<1x2x32x16xbf16>
    %50 = vector.shape_cast %49 : vector<1x2x32x16xbf16> to vector<2x32x16xbf16>
    "tpu.trace_start"() <{level = 10 : i32, message = "htc,hcd->htd"}> : () -> ()
    %cst_34 = arith.constant dense<0.000000e+00> : vector<2x8x16xf32>
    %51 = tpu.matmul %34, %50, %cst_34 {dimension_numbers = #tpu.dot_dimension_numbers<[2], [1], [1], [2], [0, 0, 0, 1, 1, 2], [0], [0]>} : vector<2x8x32xbf16>, vector<2x32x16xbf16>, vector<2x8x16xf32> -> vector<2x8x16xf32>
    "tpu.trace_stop"() : () -> ()
    %c0_35 = arith.constant 0 : index
    %c0_36 = arith.constant 0 : index
    %c0_37 = arith.constant 0 : index
    %c0_38 = arith.constant 0 : index
    %52 = vector.load %arg10[%c0_35, %c0_36, %c0_37, %c0_38] : memref<1x2x1x16xf32, #tpu.memory_space<vmem>>, vector<1x2x1x16xf32>
    %53 = vector.shape_cast %52 : vector<1x2x1x16xf32> to vector<2x1x16xf32>
    %54 = vector.broadcast %53 : vector<2x1x16xf32> to vector<2x8x16xf32>
    %55 = arith.addf %51, %54 : vector<2x8x16xf32>
    %56 = arith.truncf %41 : vector<2x8x16xf32> to vector<2x8x16xbf16>
    %57 = arith.truncf %48 : vector<2x8x16xf32> to vector<2x8x16xbf16>
    "tpu.trace_start"() <{level = 10 : i32, message = "hqd,hkd->hqk"}> : () -> ()
    %cst_39 = arith.constant dense<0.000000e+00> : vector<2x8x8xf32>
    %58 = tpu.matmul %56, %57, %cst_39 {dimension_numbers = #tpu.dot_dimension_numbers<[2], [2], [1], [1], [0, 0, 0, 1, 1, 1], [0], [0]>} : vector<2x8x16xbf16>, vector<2x8x16xbf16>, vector<2x8x8xf32> -> vector<2x8x8xf32>
    "tpu.trace_stop"() : () -> ()
    %59 = tpu.iota {dimensions = array<i32: 1>} : vector<2x8x8xi32>
    %60 = tpu.iota {dimensions = array<i32: 2>} : vector<2x8x8xi32>
    %61 = arith.cmpi sge, %59, %60 : vector<2x8x8xi32>
    %cst_40 = arith.constant -1.000000e+30 : f32
    %62 = vector.broadcast %cst_40 : f32 to vector<2x8x8xf32>
    %63 = arith.select %61, %58, %62 : vector<2x8x8xi1>, vector<2x8x8xf32>
    %cst_41 = arith.constant dense<0xFF800000> : vector<2x8xf32>
    %64 = vector.multi_reduction <maximumf>, %63, %cst_41 [2] : vector<2x8x8xf32> to vector<2x8xf32>
    %65 = vector.shape_cast %64 : vector<2x8xf32> to vector<2x8x1xf32>
    %66 = vector.broadcast %65 : vector<2x8x1xf32> to vector<2x8x8xf32>
    %67 = arith.subf %63, %66 : vector<2x8x8xf32>
    %68 = math.exp %67 : vector<2x8x8xf32>
    %cst_42 = arith.constant dense<0.000000e+00> : vector<2x8xf32>
    %69 = vector.multi_reduction <add>, %68, %cst_42 [2] : vector<2x8x8xf32> to vector<2x8xf32>
    %70 = vector.shape_cast %69 : vector<2x8xf32> to vector<2x8x1xf32>
    %71 = tpu.reciprocal %70 {approx = true} : vector<2x8x1xf32> -> vector<2x8x1xf32>
    %72 = vector.broadcast %71 : vector<2x8x1xf32> to vector<2x8x8xf32>
    %73 = arith.mulf %68, %72 : vector<2x8x8xf32>
    %74 = arith.truncf %73 : vector<2x8x8xf32> to vector<2x8x8xbf16>
    %75 = arith.truncf %55 : vector<2x8x16xf32> to vector<2x8x16xbf16>
    "tpu.trace_start"() <{level = 10 : i32, message = "hqk,hkd->hqd"}> : () -> ()
    %cst_43 = arith.constant dense<0.000000e+00> : vector<2x8x16xf32>
    %76 = tpu.matmul %74, %75, %cst_43 {dimension_numbers = #tpu.dot_dimension_numbers<[2], [1], [1], [2], [0, 0, 0, 1, 1, 2], [0], [0]>} : vector<2x8x8xbf16>, vector<2x8x16xbf16>, vector<2x8x16xf32> -> vector<2x8x16xf32>
    "tpu.trace_stop"() : () -> ()
    %77 = arith.truncf %76 : vector<2x8x16xf32> to vector<2x8x16xbf16>
    %c0_44 = arith.constant 0 : index
    %c0_45 = arith.constant 0 : index
    %c0_46 = arith.constant 0 : index
    %c0_47 = arith.constant 0 : index
    %78 = vector.load %arg11[%c0_44, %c0_45, %c0_46, %c0_47] : memref<1x2x16x32xbf16, #tpu.memory_space<vmem>>, vector<1x2x16x32xbf16>
    %79 = vector.shape_cast %78 : vector<1x2x16x32xbf16> to vector<2x16x32xbf16>
    "tpu.trace_start"() <{level = 10 : i32, message = "htd,hdc->htc"}> : () -> ()
    %cst_48 = arith.constant dense<0.000000e+00> : vector<2x8x32xf32>
    %80 = tpu.matmul %77, %79, %cst_48 {dimension_numbers = #tpu.dot_dimension_numbers<[2], [1], [1], [2], [0, 0, 0, 1, 1, 2], [0], [0]>} : vector<2x8x16xbf16>, vector<2x16x32xbf16>, vector<2x8x32xf32> -> vector<2x8x32xf32>
    "tpu.trace_stop"() : () -> ()
    %cst_49 = arith.constant dense<0.000000e+00> : vector<8x32xf32>
    %81 = vector.multi_reduction <add>, %80, %cst_49 [0] : vector<2x8x32xf32> to vector<8x32xf32>
    %82 = arith.addf %3, %81 : vector<8x32xf32>
    %c0_50 = arith.constant 0 : index
    %c0_51 = arith.constant 0 : index
    %c0_52 = arith.constant 0 : index
    %83 = vector.load %arg12[%c0_50, %c0_51, %c0_52] : memref<1x1x32xf32, #tpu.memory_space<vmem>>, vector<1x1x32xf32>
    %84 = vector.shape_cast %83 : vector<1x1x32xf32> to vector<32xf32>
    %85 = vector.shape_cast %84 : vector<32xf32> to vector<1x32xf32>
    %86 = vector.broadcast %85 : vector<1x32xf32> to vector<8x32xf32>
    %87 = arith.addf %82, %86 : vector<8x32xf32>
    %c0_53 = arith.constant 0 : index
    %c0_54 = arith.constant 0 : index
    %c0_55 = arith.constant 0 : index
    %88 = vector.load %arg13[%c0_53, %c0_54, %c0_55] : memref<1x1x32xf32, #tpu.memory_space<vmem>>, vector<1x1x32xf32>
    %89 = vector.shape_cast %88 : vector<1x1x32xf32> to vector<32xf32>
    %c0_56 = arith.constant 0 : index
    %c0_57 = arith.constant 0 : index
    %c0_58 = arith.constant 0 : index
    %90 = vector.load %arg14[%c0_56, %c0_57, %c0_58] : memref<1x1x32xf32, #tpu.memory_space<vmem>>, vector<1x1x32xf32>
    %91 = vector.shape_cast %90 : vector<1x1x32xf32> to vector<32xf32>
    %cst_59 = arith.constant dense<0.000000e+00> : vector<8xf32>
    %92 = vector.multi_reduction <add>, %87, %cst_59 [1] : vector<8x32xf32> to vector<8xf32>
    %93 = vector.shape_cast %92 : vector<8xf32> to vector<8x1xf32>
    %cst_60 = arith.constant 3.200000e+01 : f32
    %94 = vector.broadcast %cst_60 : f32 to vector<8x1xf32>
    %95 = arith.divf %93, %94 : vector<8x1xf32>
    %96 = vector.broadcast %95 : vector<8x1xf32> to vector<8x32xf32>
    %97 = arith.subf %87, %96 : vector<8x32xf32>
    %98 = arith.mulf %97, %97 : vector<8x32xf32>
    %cst_61 = arith.constant dense<0.000000e+00> : vector<8xf32>
    %99 = vector.multi_reduction <add>, %98, %cst_61 [1] : vector<8x32xf32> to vector<8xf32>
    %100 = vector.shape_cast %99 : vector<8xf32> to vector<8x1xf32>
    %cst_62 = arith.constant 3.200000e+01 : f32
    %101 = vector.broadcast %cst_62 : f32 to vector<8x1xf32>
    %102 = arith.divf %100, %101 : vector<8x1xf32>
    %103 = vector.broadcast %95 : vector<8x1xf32> to vector<8x32xf32>
    %104 = arith.subf %87, %103 : vector<8x32xf32>
    %cst_63 = arith.constant 9.99999974E-6 : f32
    %105 = vector.broadcast %cst_63 : f32 to vector<8x1xf32>
    %106 = arith.addf %102, %105 : vector<8x1xf32>
    %107 = math.rsqrt %106 : vector<8x1xf32>
    %108 = vector.broadcast %107 : vector<8x1xf32> to vector<8x32xf32>
    %109 = arith.mulf %104, %108 : vector<8x32xf32>
    %110 = vector.shape_cast %89 : vector<32xf32> to vector<1x32xf32>
    %111 = vector.broadcast %110 : vector<1x32xf32> to vector<8x32xf32>
    %112 = arith.mulf %109, %111 : vector<8x32xf32>
    %113 = vector.shape_cast %91 : vector<32xf32> to vector<1x32xf32>
    %114 = vector.broadcast %113 : vector<1x32xf32> to vector<8x32xf32>
    %115 = arith.addf %112, %114 : vector<8x32xf32>
    %116 = arith.truncf %115 : vector<8x32xf32> to vector<8x32xbf16>
    %c0_64 = arith.constant 0 : index
    %c0_65 = arith.constant 0 : index
    %c0_66 = arith.constant 0 : index
    %117 = vector.load %arg15[%c0_64, %c0_65, %c0_66] : memref<1x32x128xbf16, #tpu.memory_space<vmem>>, vector<1x32x128xbf16>
    %118 = vector.shape_cast %117 : vector<1x32x128xbf16> to vector<32x128xbf16>
    %cst_67 = arith.constant dense<0.000000e+00> : vector<8x128xf32>
    %119 = tpu.matmul %116, %118, %cst_67 {dimension_numbers = #tpu.dot_dimension_numbers<[1], [0], [0], [1], [0, 0, 1, 1], [], []>} : vector<8x32xbf16>, vector<32x128xbf16>, vector<8x128xf32> -> vector<8x128xf32>
    %c0_68 = arith.constant 0 : index
    %c0_69 = arith.constant 0 : index
    %c0_70 = arith.constant 0 : index
    %120 = vector.load %arg16[%c0_68, %c0_69, %c0_70] : memref<1x1x128xf32, #tpu.memory_space<vmem>>, vector<1x1x128xf32>
    %121 = vector.shape_cast %120 : vector<1x1x128xf32> to vector<128xf32>
    %122 = vector.shape_cast %121 : vector<128xf32> to vector<1x128xf32>
    %123 = vector.broadcast %122 : vector<1x128xf32> to vector<8x128xf32>
    %124 = arith.addf %119, %123 : vector<8x128xf32>
    %cst_71 = arith.constant 5.000000e-01 : f32
    %125 = vector.broadcast %cst_71 : f32 to vector<8x128xf32>
    %126 = arith.mulf %125, %124 : vector<8x128xf32>
    %cst_72 = arith.constant 4.471500e-02 : f32
    %127 = vector.broadcast %cst_72 : f32 to vector<8x128xf32>
    %128 = arith.mulf %127, %124 : vector<8x128xf32>
    %129 = arith.mulf %128, %124 : vector<8x128xf32>
    %130 = arith.mulf %129, %124 : vector<8x128xf32>
    %131 = arith.addf %124, %130 : vector<8x128xf32>
    %cst_73 = arith.constant 0.797884583 : f32
    %132 = vector.broadcast %cst_73 : f32 to vector<8x128xf32>
    %133 = arith.mulf %132, %131 : vector<8x128xf32>
    %134 = math.tanh %133 : vector<8x128xf32>
    %cst_74 = arith.constant 1.000000e+00 : f32
    %135 = vector.broadcast %cst_74 : f32 to vector<8x128xf32>
    %136 = arith.addf %135, %134 : vector<8x128xf32>
    %137 = arith.mulf %126, %136 : vector<8x128xf32>
    %138 = arith.truncf %137 : vector<8x128xf32> to vector<8x128xbf16>
    %c0_75 = arith.constant 0 : index
    %c0_76 = arith.constant 0 : index
    %c0_77 = arith.constant 0 : index
    %139 = vector.load %arg17[%c0_75, %c0_76, %c0_77] : memref<1x128x32xbf16, #tpu.memory_space<vmem>>, vector<1x128x32xbf16>
    %140 = vector.shape_cast %139 : vector<1x128x32xbf16> to vector<128x32xbf16>
    %cst_78 = arith.constant dense<0.000000e+00> : vector<8x32xf32>
    %141 = tpu.matmul %138, %140, %cst_78 {dimension_numbers = #tpu.dot_dimension_numbers<[1], [0], [0], [1], [0, 0, 1, 1], [], []>} : vector<8x128xbf16>, vector<128x32xbf16>, vector<8x32xf32> -> vector<8x32xf32>
    %c0_79 = arith.constant 0 : index
    %c0_80 = arith.constant 0 : index
    %c0_81 = arith.constant 0 : index
    %142 = vector.load %arg18[%c0_79, %c0_80, %c0_81] : memref<1x1x32xf32, #tpu.memory_space<vmem>>, vector<1x1x32xf32>
    %143 = vector.shape_cast %142 : vector<1x1x32xf32> to vector<32xf32>
    %144 = vector.shape_cast %143 : vector<32xf32> to vector<1x32xf32>
    %145 = vector.broadcast %144 : vector<1x32xf32> to vector<8x32xf32>
    %146 = arith.addf %141, %145 : vector<8x32xf32>
    %147 = arith.addf %87, %146 : vector<8x32xf32>
    %c0_82 = arith.constant 0 : index
    %c0_83 = arith.constant 0 : index
    %148 = vector.load %arg22[%c0_82, %c0_83] : memref<8x32xf32, #tpu.memory_space<vmem>>, vector<8x32xf32>
    tpu.vector_store %arg22[%c0_82, %c0_83], %147 {strides = array<i32>} : memref<8x32xf32, #tpu.memory_space<vmem>>, vector<8x32xf32>,
    %c1_i32 = arith.constant 1 : i32
    %149 = arith.cmpi eq, %arg1, %c1_i32 : i32
    %150 = arith.extui %149 : i1 to i32
    %c0_i32_84 = arith.constant 0 : i32
    %151 = arith.cmpi ne, %150, %c0_i32_84 : i32
    scf.if %151 {
      %c0_85 = arith.constant 0 : index
      %c0_86 = arith.constant 0 : index
      %152 = vector.load %arg19[%c0_85, %c0_86] : memref<1x32xf32, #tpu.memory_space<vmem>>, vector<1x32xf32>
      %153 = vector.shape_cast %152 : vector<1x32xf32> to vector<32xf32>
      %c0_87 = arith.constant 0 : index
      %c0_88 = arith.constant 0 : index
      %154 = vector.load %arg20[%c0_87, %c0_88] : memref<1x32xf32, #tpu.memory_space<vmem>>, vector<1x32xf32>
      %155 = vector.shape_cast %154 : vector<1x32xf32> to vector<32xf32>
      %cst_89 = arith.constant dense<0.000000e+00> : vector<8xf32>
      %156 = vector.multi_reduction <add>, %147, %cst_89 [1] : vector<8x32xf32> to vector<8xf32>
      %157 = vector.shape_cast %156 : vector<8xf32> to vector<8x1xf32>
      %cst_90 = arith.constant 3.200000e+01 : f32
      %158 = vector.broadcast %cst_90 : f32 to vector<8x1xf32>
      %159 = arith.divf %157, %158 : vector<8x1xf32>
      %160 = vector.broadcast %159 : vector<8x1xf32> to vector<8x32xf32>
      %161 = arith.subf %147, %160 : vector<8x32xf32>
      %162 = arith.mulf %161, %161 : vector<8x32xf32>
      %cst_91 = arith.constant dense<0.000000e+00> : vector<8xf32>
      %163 = vector.multi_reduction <add>, %162, %cst_91 [1] : vector<8x32xf32> to vector<8xf32>
      %164 = vector.shape_cast %163 : vector<8xf32> to vector<8x1xf32>
      %cst_92 = arith.constant 3.200000e+01 : f32
      %165 = vector.broadcast %cst_92 : f32 to vector<8x1xf32>
      %166 = arith.divf %164, %165 : vector<8x1xf32>
      %167 = vector.broadcast %159 : vector<8x1xf32> to vector<8x32xf32>
      %168 = arith.subf %147, %167 : vector<8x32xf32>
      %cst_93 = arith.constant 9.99999974E-6 : f32
      %169 = vector.broadcast %cst_93 : f32 to vector<8x1xf32>
      %170 = arith.addf %166, %169 : vector<8x1xf32>
      %171 = math.rsqrt %170 : vector<8x1xf32>
      %172 = vector.broadcast %171 : vector<8x1xf32> to vector<8x32xf32>
      %173 = arith.mulf %168, %172 : vector<8x32xf32>
      %174 = vector.shape_cast %153 : vector<32xf32> to vector<1x32xf32>
      %175 = vector.broadcast %174 : vector<1x32xf32> to vector<8x32xf32>
      %176 = arith.mulf %173, %175 : vector<8x32xf32>
      %177 = vector.shape_cast %155 : vector<32xf32> to vector<1x32xf32>
      %178 = vector.broadcast %177 : vector<1x32xf32> to vector<8x32xf32>
      %179 = arith.addf %176, %178 : vector<8x32xf32>
      %180 = arith.truncf %179 : vector<8x32xf32> to vector<8x32xbf16>
      %c0_94 = arith.constant 0 : index
      %c0_95 = arith.constant 0 : index
      %c0_96 = arith.constant 0 : index
      %181 = vector.load %arg21[%c0_94, %c0_95, %c0_96] : memref<1x8x32xbf16, #tpu.memory_space<vmem>>, vector<1x8x32xbf16>
      %182 = vector.shape_cast %181 : vector<1x8x32xbf16> to vector<8x32xbf16>
      %183 = vector.shape_cast %180 : vector<8x32xbf16> to vector<1x8x32xbf16>
      tpu.vector_store %arg21[%c0_94, %c0_95, %c0_96], %183 {strides = array<i32>} : memref<1x8x32xbf16, #tpu.memory_space<vmem>>, vector<1x8x32xbf16>,
    } else {
    }
    return
  }
  func.func @transform_0(%arg0: i32, %arg1: i32) -> (i32, i32, i32) {
    %c0_i32 = arith.constant 0 : i32
    %c0_i32_0 = arith.constant 0 : i32
    %c0_i32_1 = arith.constant 0 : i32
    return %arg0, %c0_i32, %c0_i32_0 : i32, i32, i32
  }
  func.func @transform_1(%arg0: i32, %arg1: i32) -> (i32, i32, i32) {
    %c0_i32 = arith.constant 0 : i32
    %c0_i32_0 = arith.constant 0 : i32
    %c0_i32_1 = arith.constant 0 : i32
    return %arg1, %c0_i32, %c0_i32_0 : i32, i32, i32
  }
  func.func @transform_2(%arg0: i32, %arg1: i32) -> (i32, i32, i32) {
    %c0_i32 = arith.constant 0 : i32
    %c0_i32_0 = arith.constant 0 : i32
    %c0_i32_1 = arith.constant 0 : i32
    return %arg1, %c0_i32, %c0_i32_0 : i32, i32, i32
  }
  func.func @transform_3(%arg0: i32, %arg1: i32) -> (i32, i32, i32, i32) {
    %c0_i32 = arith.constant 0 : i32
    %c0_i32_0 = arith.constant 0 : i32
    %c0_i32_1 = arith.constant 0 : i32
    %c0_i32_2 = arith.constant 0 : i32
    return %arg1, %c0_i32, %c0_i32_0, %c0_i32_1 : i32, i32, i32, i32
  }
  func.func @transform_4(%arg0: i32, %arg1: i32) -> (i32, i32, i32, i32) {
    %c0_i32 = arith.constant 0 : i32
    %c0_i32_0 = arith.constant 0 : i32
    %c0_i32_1 = arith.constant 0 : i32
    %c0_i32_2 = arith.constant 0 : i32
    return %arg1, %c0_i32, %c0_i32_0, %c0_i32_1 : i32, i32, i32, i32
  }
  func.func @transform_5(%arg0: i32, %arg1: i32) -> (i32, i32, i32, i32) {
    %c0_i32 = arith.constant 0 : i32
    %c0_i32_0 = arith.constant 0 : i32
    %c0_i32_1 = arith.constant 0 : i32
    %c0_i32_2 = arith.constant 0 : i32
    return %arg1, %c0_i32, %c0_i32_0, %c0_i32_1 : i32, i32, i32, i32
  }
  func.func @transform_6(%arg0: i32, %arg1: i32) -> (i32, i32, i32, i32) {
    %c0_i32 = arith.constant 0 : i32
    %c0_i32_0 = arith.constant 0 : i32
    %c0_i32_1 = arith.constant 0 : i32
    %c0_i32_2 = arith.constant 0 : i32
    return %arg1, %c0_i32, %c0_i32_0, %c0_i32_1 : i32, i32, i32, i32
  }
  func.func @transform_7(%arg0: i32, %arg1: i32) -> (i32, i32, i32, i32) {
    %c0_i32 = arith.constant 0 : i32
    %c0_i32_0 = arith.constant 0 : i32
    %c0_i32_1 = arith.constant 0 : i32
    %c0_i32_2 = arith.constant 0 : i32
    return %arg1, %c0_i32, %c0_i32_0, %c0_i32_1 : i32, i32, i32, i32
  }
  func.func @transform_8(%arg0: i32, %arg1: i32) -> (i32, i32, i32, i32) {
    %c0_i32 = arith.constant 0 : i32
    %c0_i32_0 = arith.constant 0 : i32
    %c0_i32_1 = arith.constant 0 : i32
    %c0_i32_2 = arith.constant 0 : i32
    return %arg1, %c0_i32, %c0_i32_0, %c0_i32_1 : i32, i32, i32, i32
  }
  func.func @transform_9(%arg0: i32, %arg1: i32) -> (i32, i32, i32, i32) {
    %c0_i32 = arith.constant 0 : i32
    %c0_i32_0 = arith.constant 0 : i32
    %c0_i32_1 = arith.constant 0 : i32
    %c0_i32_2 = arith.constant 0 : i32
    return %arg1, %c0_i32, %c0_i32_0, %c0_i32_1 : i32, i32, i32, i32
  }
  func.func @transform_10(%arg0: i32, %arg1: i32) -> (i32, i32, i32) {
    %c0_i32 = arith.constant 0 : i32
    %c0_i32_0 = arith.constant 0 : i32
    %c0_i32_1 = arith.constant 0 : i32
    return %arg1, %c0_i32, %c0_i32_0 : i32, i32, i32
  }
  func.func @transform_11(%arg0: i32, %arg1: i32) -> (i32, i32, i32) {
    %c0_i32 = arith.constant 0 : i32
    %c0_i32_0 = arith.constant 0 : i32
    %c0_i32_1 = arith.constant 0 : i32
    return %arg1, %c0_i32, %c0_i32_0 : i32, i32, i32
  }
  func.func @transform_12(%arg0: i32, %arg1: i32) -> (i32, i32, i32) {
    %c0_i32 = arith.constant 0 : i32
    %c0_i32_0 = arith.constant 0 : i32
    %c0_i32_1 = arith.constant 0 : i32
    return %arg1, %c0_i32, %c0_i32_0 : i32, i32, i32
  }
  func.func @transform_13(%arg0: i32, %arg1: i32) -> (i32, i32, i32) {
    %c0_i32 = arith.constant 0 : i32
    %c0_i32_0 = arith.constant 0 : i32
    %c0_i32_1 = arith.constant 0 : i32
    return %arg1, %c0_i32, %c0_i32_0 : i32, i32, i32
  }
  func.func @transform_14(%arg0: i32, %arg1: i32) -> (i32, i32, i32) {
    %c0_i32 = arith.constant 0 : i32
    %c0_i32_0 = arith.constant 0 : i32
    %c0_i32_1 = arith.constant 0 : i32
    return %arg1, %c0_i32, %c0_i32_0 : i32, i32, i32
  }
  func.func @transform_15(%arg0: i32, %arg1: i32) -> (i32, i32, i32) {
    %c0_i32 = arith.constant 0 : i32
    %c0_i32_0 = arith.constant 0 : i32
    %c0_i32_1 = arith.constant 0 : i32
    return %arg1, %c0_i32, %c0_i32_0 : i32, i32, i32
  }
  func.func @transform_16(%arg0: i32, %arg1: i32) -> (i32, i32, i32) {
    %c0_i32 = arith.constant 0 : i32
    %c0_i32_0 = arith.constant 0 : i32
    %c0_i32_1 = arith.constant 0 : i32
    return %arg1, %c0_i32, %c0_i32_0 : i32, i32, i32
  }
  func.func @transform_17(%arg0: i32, %arg1: i32) -> (i32, i32) {
    %c0_i32 = arith.constant 0 : i32
    %c0_i32_0 = arith.constant 0 : i32
    %c0_i32_1 = arith.constant 0 : i32
    return %c0_i32, %c0_i32_0 : i32, i32
  }
  func.func @transform_18(%arg0: i32, %arg1: i32) -> (i32, i32) {
    %c0_i32 = arith.constant 0 : i32
    %c0_i32_0 = arith.constant 0 : i32
    %c0_i32_1 = arith.constant 0 : i32
    return %c0_i32, %c0_i32_0 : i32, i32
  }
  func.func @transform_19(%arg0: i32, %arg1: i32) -> (i32, i32, i32) {
    %c0_i32 = arith.constant 0 : i32
    %c0_i32_0 = arith.constant 0 : i32
    %c0_i32_1 = arith.constant 0 : i32
    return %arg0, %c0_i32, %c0_i32_0 : i32, i32, i32
  }
}

</mosaic_0001>

<bundles_post_ra>
// kernel: tpu_custom_call.1
= control target key start
LH: loop header
LB: loop body
LE: loop exit
PB: predicated region body
PF: predicated region fallthrough
CT: control target
= control target key end

     0   :  { %s3081_s0 = inlined_call_operand.vmem [shape: f32[2,8,32], index: 0, kind: input, shape index: {}]   ;;  %s3082_s1 = inlined_call_operand.vmem [shape: f32[2,1,32], index: 1, kind: input, shape index: {}]   ;;  %s3083_s2 = inlined_call_operand.vmem [shape: f32[2,1,32], index: 2, kind: input, shape index: {}]   ;;  %s3084_s3 = inlined_call_operand.vmem [shape: bf16[2,2,32,16], index: 3, kind: input, shape index: {}]   ;;  %s3085_s4 = inlined_call_operand.vmem [shape: f32[2,2,1,16], index: 4, kind: input, shape index: {}]   ;;  %s3086_s5 = inlined_call_operand.vmem [shape: bf16[2,2,32,16], index: 5, kind: input, shape index: {}]   ;;  %s3087_s6 = inlined_call_operand.vmem [shape: f32[2,2,1,16], index: 6, kind: input, shape index: {}]   ;;  %s3088_s7 = inlined_call_operand.vmem [shape: bf16[2,2,32,16], index: 7, kind: input, shape index: {}]   ;;  %s3089_s8 = inlined_call_operand.vmem [shape: f32[2,2,1,16], index: 8, kind: input, shape index: {}]   ;;  %s3090_s9 = inlined_call_operand.vmem [shape: bf16[2,2,16,32], index: 9, kind: input, shape index: {}]   ;;  %s3091_s10 = inlined_call_operand.vmem [shape: f32[2,1,32], index: 10, kind: input, shape index: {}]   ;;  %s3092_s11 = inlined_call_operand.vmem [shape: f32[2,1,32], index: 11, kind: input, shape index: {}]   ;;  %s3093_s12 = inlined_call_operand.vmem [shape: f32[2,1,32], index: 12, kind: input, shape index: {}]   ;;  %s3094_s13 = inlined_call_operand.vmem [shape: bf16[2,32,128], index: 13, kind: input, shape index: {}]   ;;  %s3095_s14 = inlined_call_operand.vmem [shape: f32[2,1,128], index: 14, kind: input, shape index: {}]   ;;  %s3096_s15 = inlined_call_operand.vmem [shape: bf16[2,128,32], index: 15, kind: input, shape index: {}]   ;;  %s3097_s16 = inlined_call_operand.vmem [shape: f32[2,1,32], index: 16, kind: input, shape index: {}]   ;;  %s3098_s17 = inlined_call_operand.vmem [shape: f32[1,32], index: 17, kind: input, shape index: {}]   ;;  %s3099_s18 = inlined_call_operand.vmem [shape: f32[1,32], index: 18, kind: input, shape index: {}]   ;;  %s3100_s19 = inlined_call_operand.hbm [shape: bf16[2,8,32], index: 19, kind: output, shape index: {}]  }
   0x1   :  { %3117 = sst [smem:[#allocation20_spill]] %s3081_s0 }
   0x2   :  { %3118 = sst [smem:[#allocation21_spill]] %s3082_s1 }
   0x3   :  { %3119 = sst [smem:[#allocation22_spill]] %s3083_s2 }
   0x4   :  { %3120 = sst [smem:[#allocation23_spill]] %s3084_s3 }
   0x5   :  { %3121 = sst [smem:[#allocation24_spill]] %s3085_s4 }
   0x6   :  { %3122 = sst [smem:[#allocation25_spill]] %s3086_s5 }
   0x7   :  { %3123 = sst [smem:[#allocation26_spill]] %s3087_s6 }
   0x8   :  { %3124 = sst [smem:[#allocation27_spill]] %s3088_s7 }
   0x9   :  { %3125 = sst [smem:[#allocation28_spill]] %s3089_s8 }
   0xa   :  { %3126 = sst [smem:[#allocation29_spill]] %s3090_s9 }
   0xb   :  { %3127 = sst [smem:[#allocation30_spill]] %s3091_s10 }
   0xc   :  { %3128 = sst [smem:[#allocation31_spill]] %s3092_s11 }
   0xd   :  { %3129 = sst [smem:[#allocation32_spill]] %s3096_s15 }
   0xe   :  { %3130 = sst [smem:[#allocation33_spill]] %s3097_s16 }
   0xf   :  { %3131 = sst [smem:[#allocation34_spill]] %s3098_s17 }
  0x10   :  { %3132 = sst [smem:[#allocation35_spill]] %s3099_s18 }
  0x11   :  { %3133 = sst [smem:[#allocation36_spill]] %s3100_s19 }
  0x12   :  { %24 = vsyncpa [#allocation4], 0 }
  0x13   :  { %26 = vsyncpa [#allocation4 + $0x1], 0  ;;  %s2701_s0 = smov 0   ;;  %s2703_s30 = smov 0  }
  0x14   :  { %s2705_s20 = smov 0   ;;  %s2707_s21 = smov 0  }
  0x15   :  { %s2709_s1 = smov 0   ;;  %s2711_s22 = smov 0  }
  0x16   :  { %s2713_s2 = smov 0   ;;  %s2715_s23 = smov 0  }
  0x17 LB: > { %3134 = sst [smem:[#allocation6_spill]] %s2568_s0  ;;  %s2151_s24 = sadd.s32 4294967295, %s2596_s23   ;;  %s2596_s23 = sphi %s2715_s23, %s32_s23   ;;  %s2592_s2 = sphi %s2713_s2, %s3193_s2   ;;  %s2588_s22 = sphi %s2711_s22, %s3192_s22   ;;  %s2584_s1 = sphi %s2709_s1, %s3191_s1   ;;  %s2580_s21 = sphi %s2707_s21, %s3190_s21   ;;  %s2576_s20 = sphi %s2705_s20, %s3189_s20   ;;  %s2572_s30 = sphi %s2703_s30, %s3188_s30   ;;  %s2568_s0 = sphi %s2701_s0, %s3187_s0  }
  0x18   : > { %3135 = sst [smem:[#allocation7_spill]] %s2572_s30  ;;  %s2152_s25 = sadd.s32 4294967294, %s2596_s23  }
  0x19   : > { %3136 = sst [smem:[#allocation8_spill]] %s2576_s20  ;;  %s41_s3 = sadd.s32 1, %s2588_s22 }
  0x1a   : > { %3137 = sst [smem:[#allocation9_spill]] %s2580_s21  ;;  %p42_p0 = scmp.ge.s32.totalorder %s41_s3, 2 }
  0x1b   : > { %3138 = sst [smem:[#allocation10_spill]] %s2584_s1  ;;  %s44_s26 = sadd.s32 1, %s2592_s2 }
  0x1c   : > { %3139 = sst [smem:[#allocation11_spill]] %s2588_s22  ;;  %p545_p1 = scmp.ne.s32.totalorder %s2576_s20, %s2572_s30 }
  0x1d   : > { %3140 = sst [smem:[#allocation12_spill]] %s2592_s2  ;;  %p546_p2 = scmp.eq.s32.totalorder %s2151_s24, 3 }
  0x1e   : > { %3141 = sst [smem:[#allocation13_spill]] %s2596_s23  ;;  %s3195_s3 = smov (%p42_p0, %s41_s3), 0 }
  0x1f   : > { %3142 = sst [smem:[#allocation14_spill]] %s3195_s3  ;;  %s3197_s26 = smov (!%p42_p0, %s44_s26), %s2592_s2 }
  0x20   : > { %p2750_p3 = por %p546_p2, %p545_p1  ;;  %p551_p4 = scmp.ne.s32.totalorder %s2572_s30, %s2568_s0 }
  0x21   : > { %p46_p5 = scmp.ge.s32.totalorder %s3197_s26, 2  ;;  %p552_p6 = scmp.eq.s32.totalorder %s2152_s25, 3 }
  0x22   : > { %s3143_s27 = scalar_select %p2750_p3, 1, 0 }
  0x23   : > { %p2155_p7 = scmp.ge.s32.totalorder %s2596_s23, 1  ;;  %p694_p8 = scmp.lt.s32.totalorder %s2596_s23, 5 }
  0x24   : > { %3144 = sst [smem:[#allocation15_spill]] %s3143_s27  ;;  %s3199_s26 = smov (%p46_p5, %s3197_s26), 0 }
  0x25   : > { %3145 = sst [smem:[#allocation16_spill]] %s3199_s26  ;;  %p2760_p9 = por %p552_p6, %p551_p4 }
  0x26   : > { %p695_p10 = pnand %p2155_p7, %p694_p8  ;;  %s532_s29 = ssub.s32 %s2592_s2, %s3199_s26 }
  0x27   : > { %s3146_s28 = scalar_select %p2760_p9, 1, 0 }
  0x28   : > { %s535_s24 = sadd.s32 1, %s2576_s20  ;;  %p533_p11 = scmp.eq.s32.totalorder %s532_s29, 0 }
  0x29   : > { %3147 = sst [smem:[#allocation17_spill]] %s3146_s28  ;;  %698 = sbr.rel (%p695_p10) target bundleno = 2590 (0xa1e), region = 96 }
  0x2a   : > { %s2768_s3 = scalar_select %p533_p11, %s2576_s20, %s535_s24  }
  0x2c   : > { %3148 = sst [smem:[#allocation18_spill]] %s2768_s3 }
  0x2e   : > { %s3107_s25 = sand.u32 1, %s2572_s30   ;;  %p812_p12 = scmp.lt.s32.totalorder %s2584_s1, 1 }
  0x2f   : > { %s2774_s22 = sshll.u32 %s3107_s25, 2  ;;  %p816_p13 = scmp.lt.s32.totalorder %s2580_s21, 1 }
  0x30   : > { %s813_s28 = scalar_select %p812_p12, %s2584_s1, 1 }
  0x31   : > { %s2779_s0 = scalar_select %p816_p13, %s2580_s21, 1 }
  0x32   : > { %s2157_s29 = sshll.u32 %s813_s28, 3  ;;  %s3149_s2 = sld [smem:[#allocation20_spill]] }
  0x33   : > { %s2231_s17 = sshll.u32 %s2779_s0, 5  ;;  %s3152_s16 = sld [smem:[#allocation23_spill]] }
  0x34   : > { %s2160_s26 = sshll.u32 %s2779_s0, 1  ;;  %s3153_s4 = sld [smem:[#allocation24_spill]] }
  0x35   : > { %s3155_s5 = sld [smem:[#allocation25_spill]]  ;;  %s2234_s19 = sshll.u32 %s2779_s0, 4 }
  0x36   : > { %s3156_s6 = sld [smem:[#allocation26_spill]]  ;;  %s862_s18 = scalar_lea.vmem %s3093_s12, %s2779_s0 }
  0x37   : > { %s3157_s7 = sld [smem:[#allocation27_spill]]  ;;  %s811_s15 = scalar_lea.vmem [#allocation3], %s2774_s22 }
  0x38   : > { %s815_s3 = scalar_lea.vmem %s3149_s2, %s2157_s29  ;;  %s3158_s8 = sld [smem:[#allocation28_spill]] }
  0x39   : > { %s2796_s28 = scalar_lea.vmem %s3152_s16, %s2231_s17  ;;  %s3159_s9 = sld [smem:[#allocation29_spill]] }
  0x3a   : > { %s2802_s20 = scalar_lea.vmem %s3153_s4, %s2160_s26  ;;  %s3162_s27 = sld [smem:[#allocation33_spill]] }
  0x3b   : > { %3154 = sst [smem:[#allocation19_spill]] %s2802_s20  ;;  %s2807_s30 = scalar_lea.vmem %s3155_s5, %s2231_s17 }
  0x3c   : > { %s2812_s29 = scalar_lea.vmem %s3156_s6, %s2160_s26  ;;  %s3164_s16 = sld [smem:[#allocation9_spill]] }
  0x3d   : > { %s2817_s21 = scalar_lea.vmem %s3157_s7, %s2231_s17  ;;  %s2845_s7 = scalar_lea.vmem %s3094_s13, %s2234_s19 }
  0x3e   : > { %s2822_s2 = scalar_lea.vmem %s3158_s8, %s2160_s26  ;;  %s870_s8 = scalar_lea.vmem %s3095_s14, %s2779_s0 }
  0x3f   : > { %s2828_s25 = scalar_lea.vmem %s3159_s9, %s2234_s19  ;;  %s2236_s9 = sshll.u32 %s2779_s0, 6 }
  0x40   : > { %s878_s10 = scalar_lea.vmem %s3162_s27, %s2779_s0  ;;  %s3163_s17 = sld [smem:[#allocation32_spill]] }
  0x42   : > { %p2173_p0 = scmp.ne.s32.totalorder %s3164_s16, 0 }
  0x44   : > { %883 = sbr.rel (%p2173_p0) target bundleno = 75 (0x4b), region = 100 }
  0x46   : > { %s2859_s11 = scalar_lea.vmem %s3163_s17, %s2236_s9 }
  0x49   : > { %v884_v0 = vld [vmem:[%s815_s3] sm:$0xff]  ;;  %vm885_vm0 = vcmask 261120  }
  0x4a   : > { %886 = vst.msk [vmem:[#allocation2] sm:$0xff] %vm885_vm0, %v884_v0 }
  0x4b PF: > { %vm890_vm1 = vcmask 261120   ;;  %v2464_v8 = vld [vmem:[%s2796_s28 + $0x8] sm:$0xff]   ;;  %v2465_v9 = vld [vmem:[%s2807_s30 + $0x18] sm:$0xff]   ;;  %v2598_v10 = vmov 0.0   ;;  %v2466_v11 = vld [vmem:[%s2796_s28] sm:$0xff]   ;;  %vm2599_vm2 = vmmov 0  }
  0x4c   : > { %2279 = vmatprep.subr.bf16.mxu0 %v2598_v10  ;;  %2303 = vmatprep.subr.bf16.mxu1 %v2598_v10  ;;  %v2467_v12 = vld [vmem:[%s2807_s30 + $0x10] sm:$0xff]   ;;  %s3165_s3 = sld [smem:[#allocation21_spill]]  ;;  %v2468_v22 = vld [vmem:[%s2796_s28 + $0x18] sm:$0xff]   ;;  %v2472_v27 = vld [vmem:[%s2807_s30 + $0x8] sm:$0xff]   ;;  %vm1305_vm3 = vcmask 130048   ;;  %vm1435_vm4 = vcmask 1043456  }
  0x4d   : > { %2280 = vmatpush3.bf16.msra.mxu0 %v2464_v8  ;;  %2304 = vmatpush3.bf16.msra.mxu1 %v2465_v9  ;;  %s3167_s24 = sld [smem:[#allocation22_spill]]  ;;  %v2469_v23 = vld [vmem:[%s2817_s21 + $0x18] sm:$0xff]   ;;  %v2470_v25 = vld [vmem:[%s2796_s28 + $0x10] sm:$0xff]   ;;  %v2473_v28 = vld [vmem:[%s2807_s30] sm:$0xff]   ;;  %vm1405_vm6 = vcmask 64512  }
  0x4e   : > { %2281 = vmatprep.subr.bf16.mxu0 %v2598_v10  ;;  %2305 = vmatprep.subr.bf16.mxu1 %v2598_v10  ;;  %v2471_v26 = vld [vmem:[%s2817_s21 + $0x10] sm:$0xff]   ;;  %v2474_v29 = vld [vmem:[%s2817_s21 + $0x8] sm:$0xff]   ;;  %v2475_v30 = vld [vmem:[%s2817_s21] sm:$0xff]   ;;  %s3169_s28 = sld [smem:[#allocation19_spill]] }
  0x4f   : > { %2283 = vmatprep.mubr.msk.bf16.mxu0 %vm2599_vm2, %v2598_v10  ;;  %2307 = vmatprep.mubr.msk.bf16.mxu1 %vm2599_vm2, %v2598_v10  ;;  %v2185_v31 = vld [vmem:[%s2812_s29 + $0x1] ss:$0 sm:$0xff]  ;;  %v2184_v58 = vld [vmem:[%s2812_s29] ss:$0 sm:$0xff]  ;;  %s3170_s21 = sld [smem:[#allocation30_spill]] }
  0x50   : > { %v2193_v44 = vld [vmem:[%s2822_s2 + $0x1] ss:$0 sm:$0xff]  ;;  %s3172_s5 = sld [smem:[#allocation31_spill]] }
  0x51   : > { %v2863_v1 = vld [vmem:[#allocation2] sm:$0xff]  ;;  %2282 = vmatpush3.bf16.msra.mxu0 %v2466_v11  ;;  %2306 = vmatpush3.bf16.msra.mxu1 %v2467_v12  ;;  %s3175_s9 = sld [smem:[#allocation9_spill]] }
  0x52   : > { %v891_v2 = vsel %vm890_vm1, %v2863_v1, 0.0  ;;  %2287 = vmatprep.subr.bf16.mxu0 %v2598_v10  ;;  %2319 = vmatprep.subr.bf16.mxu1 %v2598_v10  ;;  %s3166_s27 = scalar_lea.vmem %s3165_s3, %s2779_s0 }
  0x53   : > { %892 = vadd.xlane.f32.xlu0 %v891_v2  ;;  %v2174_v17 = vld [vmem:[%s3166_s27] ss:$0 sm:$0xff]  ;;  %s3168_s4 = scalar_lea.vmem %s3167_s24, %s2779_s0 }
  0x54   : > { %v2175_v19 = vld [vmem:[%s3168_s4] ss:$0 sm:$0xff]  ;;  %v2177_v43 = vld [vmem:[%s3169_s28 + $0x1] ss:$0 sm:$0xff] }
  0x55   : > { %v2176_v63 = vld [vmem:[%s3169_s28] ss:$0 sm:$0xff] }
  0x56   : > { %s3173_s1 = scalar_lea.vmem %s3172_s5, %s2779_s0 }
  0x57   : > { %p2224_p1 = scmp.ne.s32.totalorder %s3175_s9, 1 }
  0x58   : > { %s3176_s19 = sld [smem:[#allocation34_spill]] (!%p2224_p1) }
  0x59   : > { %s3177_s17 = sld [smem:[#allocation35_spill]] (!%p2224_p1) }
  0xdc   : > { %v893_v3 = vpop.xlane.xlu0 %892 }
  0xdd   : > { %v895_v4 = vmul.f32 0.03125, %v893_v3 }
  0xdf   : > { %v896_v5 = vsub.f32 %v2863_v1, %v895_v4  ;;  %v2192_v4 = vld [vmem:[%s2822_s2] ss:$0 sm:$0xff]  ;;  %s3171_s2 = scalar_lea.vmem %s3170_s21, %s2779_s0 }
  0xe1   : > { %v897_v6 = vmul.f32 %v896_v5, %v896_v5 }
  0xe3   : > { %v898_v7 = vsel %vm890_vm1, %v897_v6, 0.0 }
  0xe4   : > { %899 = vadd.xlane.f32.xlu0 %v898_v7 }
 0x16d   : > { %v900_v13 = vpop.xlane.xlu0 %899 }
 0x16e   : > { %v901_v14 = vmul.f32 0.03125, %v900_v13 }
 0x170   : > { %v902_v15 = vadd.f32 1e-05, %v901_v14 }
 0x172   : > { %2488 = vrsqrt.f32 %v902_v15 }
 0x17f   : > { %v2489_v16 = vpop.eup %2488 }
 0x180   : > { %v904_v18 = vmul.f32 %v2489_v16, %v896_v5 }
 0x182   : > { %v911_v20 = vmul.f32 %v2174_v17, %v904_v18 }
 0x184   : > { %v918_v21 = vadd.f32 %v2175_v19, %v911_v20  ;;  %v1398_v19 = vlaneseq }
 0x186   : > { %v919_v24 = vpack.c.bf16 %v918_v21, %v918_v21  ;;  %v1399_v20 = vshrl.u32 %v1398_v19, 7  ;;  %v1401_v21 = vand.u32 127, %v1398_v19 }
 0x188   : > { %2284 = vmatmul.mubr.msk.bf16.vlgmr.msra.gmra.mxu0 %vm890_vm1, %v919_v24  ;;  %2308 = vmatmul.mubr.msk.bf16.vlgmr.msra.gmra.mxu1 %vm890_vm1, %v919_v24  ;;  %vm1402_vm5 = vcmp.ge.s32.totalorder %v1399_v20, %v1401_v21 }
 0x189   : > { %2288 = vmatpush3.bf16.msra.mxu0 %v2468_v22  ;;  %2320 = vmatpush3.bf16.msra.mxu1 %v2469_v23 }
 0x18a   : > { %2289 = vmatprep.subr.bf16.mxu0 %v2598_v10  ;;  %2321 = vmatprep.subr.bf16.mxu1 %v2598_v10 }
 0x18b   : > { %2291 = vmatprep.mubr.msk.bf16.mxu0 %vm2599_vm2, %v2598_v10  ;;  %2323 = vmatprep.mubr.msk.bf16.mxu1 %vm2599_vm2, %v2598_v10 }
 0x18d   : > { %2290 = vmatpush3.bf16.msra.mxu0 %v2470_v25  ;;  %2322 = vmatpush3.bf16.msra.mxu1 %v2471_v26 }
 0x18e   : > { %2295 = vmatprep.subr.bf16.mxu0 %v2598_v10  ;;  %2333 = vmatprep.subr.bf16.mxu1 %v2598_v10 }
 0x190   : > { %2292 = vmatmul.mubr.msk.bf16.vlgmr.msra.gmra.mxu0 %vm890_vm1, %v919_v24  ;;  %2324 = vmatmul.mubr.msk.bf16.vlgmr.msra.gmra.mxu1 %vm890_vm1, %v919_v24 }
 0x191   : > { %2296 = vmatpush3.bf16.msra.mxu0 %v2472_v27  ;;  %2299 = vmatprep.mubr.msk.bf16.mxu0 %vm2599_vm2, %v2598_v10 }
 0x192   : > { %2297 = vmatprep.subr.bf16.mxu0 %v2598_v10  ;;  %2335 = vmatprep.mubr.msk.bf16.mxu1 %vm2599_vm2, %v2598_v10 }
 0x195   : > { %2298 = vmatpush3.bf16.msra.mxu0 %v2473_v28 }
 0x196   : > { %2311 = vmatprep.subr.bf16.mxu0 %v2598_v10 }
 0x198   : > { %2300 = vmatmul.mubr.msk.bf16.vlgmr.msra.gmra.mxu0 %vm890_vm1, %v919_v24 }
 0x199   : > { %2312 = vmatpush3.bf16.msra.mxu0 %v2474_v29  ;;  %2315 = vmatprep.mubr.msk.bf16.mxu0 %vm2599_vm2, %v2598_v10 }
 0x19a   : > { %2313 = vmatprep.subr.bf16.mxu0 %v2598_v10 }
 0x19d   : > { %2314 = vmatpush3.bf16.msra.mxu0 %v2475_v30 }
 0x19e   : > { %2327 = vmatprep.subr.bf16.mxu0 %v2598_v10 }
 0x1a0   : > { %2316 = vmatmul.mubr.msk.bf16.vlgmr.msra.gmra.mxu0 %vm890_vm1, %v919_v24 }
 0x1a1   : > { %2329 = vmatprep.mubr.msk.bf16.mxu0 %vm2599_vm2, %v2598_v10 }
 0x248   : > { %v991_v32 = vpop.f32.mrf.mxu0  ;;  %v1169_v33 = vpop.f32.mrf.mxu1 }
 0x249   : > { %v1170_v34 = vadd.f32 %v2185_v31, %v1169_v33  ;;  %v992_v5 = vadd.f32 %v2176_v63, %v991_v32 }
 0x24a   : > { %v2285_v35 = vpop.f32.mrf.mxu0  ;;  %v2309_v36 = vpop.f32.mrf.mxu1 }
 0x24b   : > { %v1304_v37 = vpack.c.bf16 %v1170_v34, %v1170_v34  ;;  %v1301_v9 = vpack.c.bf16 %v992_v5, %v992_v5 }
 0x24c   : > { %v994_v38 = vpop.f32.mrf.mxu0  ;;  %v1172_v39 = vpop.f32.mrf.mxu1 }
 0x24d   : > { %v1356_v40 = vsel %vm1305_vm3, %v1304_v37, 0 }
 0x24e   : > { %v2286_v41 = vpop.f32.mrf.mxu0  ;;  %v2310_v42 = vpop.f32.mrf.mxu1  ;;  %2334 = vmatpush3.bf16.xpose.msra.mxu1 %v1356_v40 }
 0x24f   : > { %2345 = vmatprep.subr.bf16.mxu1 %v2598_v10 }
 0x250   : > { %v1043_v45 = vpop.f32.mrf.mxu0  ;;  %v1295_v46 = vpop.f32.mrf.mxu1 }
 0x251   : > { %v1044_v47 = vadd.f32 %v2177_v43, %v1043_v45  ;;  %v1296_v48 = vadd.f32 %v2193_v44, %v1295_v46 }
 0x252   : > { %v2293_v49 = vpop.f32.mrf.mxu0  ;;  %v2325_v50 = vpop.f32.mrf.mxu1 }
 0x253   : > { %v1302_v51 = vpack.c.bf16 %v1044_v47, %v1044_v47  ;;  %v1431_v52 = vpack.c.bf16 %v1296_v48, %v1296_v48  ;;  %v2476_v48 = vld [vmem:[%s2828_s25] sm:$0xff]   ;;  %v2477_v49 = vld [vmem:[%s2828_s25 + $0x8] sm:$0xff]  }
 0x254   : > { %v1046_v53 = vpop.f32.mrf.mxu0  ;;  %v1298_v54 = vpop.f32.mrf.mxu1 }
 0x255   : > { %v1483_v55 = vsel %vm1435_vm4, %v1431_v52, 0  ;;  %2336 = vmatmul.mubr.msk.bf16.vlgmr.msra.gmra.mxu1 %vm1305_vm3, %v1302_v51 }
 0x256   : > { %v2294_v56 = vpop.f32.mrf.mxu0  ;;  %v2326_v57 = vpop.f32.mrf.mxu1  ;;  %2346 = vmatpush3.bf16.msra.mxu1 %v1483_v55  ;;  %2347 = vmatprep.mubr.msk.bf16.mxu1 %vm2599_vm2, %v2598_v10 }
 0x257   : > { %2357 = vmatprep.subr.bf16.mxu1 %v2598_v10 }
 0x258   : > { %v1117_v59 = vpop.f32.mrf.mxu0 }
 0x259   : > { %v1118_v60 = vadd.f32 %v2184_v58, %v1117_v59 }
 0x25a   : > { %v2301_v61 = vpop.f32.mrf.mxu0 }
 0x25b   : > { %v1303_v62 = vpack.c.bf16 %v1118_v60, %v1118_v60 }
 0x25c   : > { %v1120_v0 = vpop.f32.mrf.mxu0 }
 0x25d   : > { %v1310_v2 = vsel %vm1305_vm3, %v1303_v62, 0 }
 0x25e   : > { %v2302_v3 = vpop.f32.mrf.mxu0  ;;  %2328 = vmatpush3.bf16.xpose.msra.mxu0 %v1310_v2 }
 0x25f   : > { %2339 = vmatprep.subr.bf16.mxu0 %v2598_v10 }
 0x260   : > { %v1243_v6 = vpop.f32.mrf.mxu0 }
 0x261   : > { %v1244_v7 = vadd.f32 %v2192_v4, %v1243_v6  ;;  %v2208_v6 = vld [vmem:[%s3171_s2] ss:$0 sm:$0xff] }
 0x262   : > { %v2317_v8 = vpop.f32.mrf.mxu0 }
 0x263   : > { %v1430_v11 = vpack.c.bf16 %v1244_v7, %v1244_v7 }
 0x264   : > { %v1246_v12 = vpop.f32.mrf.mxu0 }
 0x265   : > { %v1437_v13 = vsel %vm1435_vm4, %v1430_v11, 0  ;;  %2330 = vmatmul.mubr.msk.bf16.vlgmr.msra.gmra.mxu0 %vm1305_vm3, %v1301_v9 }
 0x266   : > { %v2318_v14 = vpop.f32.mrf.mxu0  ;;  %2340 = vmatpush3.bf16.msra.mxu0 %v1437_v13  ;;  %2341 = vmatprep.mubr.msk.bf16.mxu0 %vm2599_vm2, %v2598_v10 }
 0x267   : > { %2351 = vmatprep.subr.bf16.mxu0 %v2598_v10 }
 0x315   : > { %v1392_v15 = vpop.f32.mrf.mxu1 }
 0x316   : > { %v1404_v26 = vsel %vm1402_vm5, %v1392_v15, -1e+30 }
 0x317   : > { %v2337_v16 = vpop.f32.mrf.mxu1  ;;  %v1409_v29 = vsel %vm1405_vm6, %v1404_v26, -inf }
 0x319   : > { %v1395_v17 = vpop.f32.mrf.mxu1 }
 0x31b   : > { %v2338_v18 = vpop.f32.mrf.mxu1 }
 0x31c   : > { %v2478_v18 = vld [vmem:[%s2845_s7 + $0x8] sm:$0xff]  }
 0x325   : > { %v1346_v22 = vpop.f32.mrf.mxu0 }
 0x326   : > { %v1403_v23 = vsel %vm1402_vm5, %v1346_v22, -1e+30 }
 0x327   : > { %v2331_v24 = vpop.f32.mrf.mxu0  ;;  %v1406_v25 = vsel %vm1405_vm6, %v1403_v23, -inf }
 0x328   : > { %1407 = vmax.xlane.f32.xlu1 %v1406_v25  ;;  %v2210_v25 = vld [vmem:[%s862_s18] ss:$0 sm:$0xff] }
 0x329   : > { %v1349_v27 = vpop.f32.mrf.mxu0 }
 0x32b   : > { %v2332_v28 = vpop.f32.mrf.mxu0 }
 0x32c   : > { %1410 = vmax.xlane.f32.xlu1 %v1409_v29  ;;  %v2480_v29 = vld [vmem:[%s2859_s11 + $0x38] sm:$0xff]  }
 0x3b1   : > { %v1408_v30 = vpop.xlane.xlu1 %1407 }
 0x3b2   : > { %v1412_v31 = vsub.f32 %v1403_v23, %v1408_v30  ;;  %v2209_v23 = vld [vmem:[%s3173_s1] ss:$0 sm:$0xff]  ;;  %v2481_v30 = vld [vmem:[%s2859_s11 + $0x30] sm:$0xff]  }
 0x3b4   : > { %v1414_v32 = vmul.f32 1.442695, %v1412_v31  ;;  %v2482_v31 = vld [vmem:[%s2859_s11 + $0x28] sm:$0xff]  }
 0x3b5   : > { %v1411_v33 = vpop.xlane.xlu1 %1410 }
 0x3b6   : > { %2490 = vpow2.f32 %v1414_v32  ;;  %v1413_v34 = vsub.f32 %v1404_v26, %v1411_v33  ;;  %v2483_v32 = vld [vmem:[%s2859_s11 + $0x20] sm:$0xff]   ;;  %v2484_v33 = vld [vmem:[%s2859_s11 + $0x18] sm:$0xff]  }
 0x3b8   : > { %v1416_v35 = vmul.f32 1.442695, %v1413_v34  ;;  %v2485_v34 = vld [vmem:[%s2859_s11 + $0x10] sm:$0xff]  }
 0x3ba   : > { %2492 = vpow2.f32 %v1416_v35  ;;  %v2486_v35 = vld [vmem:[%s2859_s11 + $0x8] sm:$0xff]  }
 0x3c3   : > { %v2491_v36 = vpop.eup %2490 }
 0x3c4   : > { %v1418_v37 = vsel %vm1405_vm6, %v2491_v36, 0.0 }
 0x3c5   : > { %1419 = vadd.xlane.f32.xlu0 %v1418_v37  ;;  %v2211_v37 = vld [vmem:[%s870_s8] ss:$0 sm:$0xff] }
 0x3c7   : > { %v2493_v38 = vpop.eup %2492 }
 0x3c8   : > { %v1421_v39 = vsel %vm1405_vm6, %v2493_v38, 0.0 }
 0x3c9   : > { %1422 = vadd.xlane.f32.xlu1 %v1421_v39 }
 0x44e   : > { %v1420_v40 = vpop.xlane.xlu0 %1419 }
 0x44f   : > { %2494 = vrcp.f32 %v1420_v40 }
 0x452   : > { %v1423_v41 = vpop.xlane.xlu1 %1422 }
 0x453   : > { %2496 = vrcp.f32 %v1423_v41 }
 0x45c   : > { %v2495_v42 = vpop.eup %2494 }
 0x45d   : > { %v1426_v43 = vmul.f32 %v2495_v42, %v2491_v36  ;;  %v2487_v36 = vld [vmem:[%s2859_s11] sm:$0xff]  }
 0x45f   : > { %v1428_v44 = vpack.c.bf16 %v1426_v43, %v1426_v43 }
 0x460   : > { %v2497_v45 = vpop.eup %2496 }
 0x461   : > { %2342 = vmatmul.mubr.msk.bf16.vlgmr.msra.gmra.mxu0 %vm1405_vm6, %v1428_v44  ;;  %v1427_v46 = vmul.f32 %v2497_v45, %v2493_v38 }
 0x462   : > { %2353 = vmatprep.mubr.msk.bf16.mxu0 %vm2599_vm2, %v2598_v10  ;;  %2352 = vmatpush3.bf16.msra.mxu0 %v2476_v48 }
 0x463   : > { %v1429_v47 = vpack.c.bf16 %v1427_v46, %v1427_v46  ;;  %2363 = vmatprep.subr.bf16.mxu0 %v2598_v10 }
 0x465   : > { %2348 = vmatmul.mubr.msk.bf16.vlgmr.msra.gmra.mxu1 %vm1405_vm6, %v1429_v47 }
 0x466   : > { %2359 = vmatprep.mubr.msk.bf16.mxu1 %vm2599_vm2, %v2598_v10  ;;  %2358 = vmatpush3.bf16.msra.mxu1 %v2477_v49 }
 0x467   : > { %2371 = vmatprep.subr.bf16.mxu1 %v2598_v10 }
 0x521   : > { %v1473_v50 = vpop.f32.mrf.mxu0 }
 0x522   : > { %v1525_v51 = vpack.c.bf16 %v1473_v50, %v1473_v50 }
 0x523   : > { %v2343_v52 = vpop.f32.mrf.mxu0 }
 0x524   : > { %2354 = vmatmul.mubr.msk.bf16.vlgmr.msra.gmra.mxu0 %vm1305_vm3, %v1525_v51  ;;  %v2215_v52 = vld [vmem:[%s878_s10] ss:$0 sm:$0xff] }
 0x525   : > { %v1476_v53 = vpop.f32.mrf.mxu0  ;;  %v1519_v54 = vpop.f32.mrf.mxu1  ;;  %2367 = vmatprep.mubr.msk.bf16.mxu0 %vm2599_vm2, %v2598_v10  ;;  %2364 = vmatpush3.bf16.msra.mxu0 %v2478_v18 }
 0x526   : > { %v1526_v55 = vpack.c.bf16 %v1519_v54, %v1519_v54  ;;  %2365 = vmatprep.subr.bf16.mxu0 %v2598_v10 }
 0x527   : > { %v2344_v56 = vpop.f32.mrf.mxu0  ;;  %v2349_v57 = vpop.f32.mrf.mxu1 }
 0x528   : > { %2360 = vmatmul.mubr.msk.bf16.vlgmr.msra.gmra.mxu1 %vm1305_vm3, %v1526_v55 }
 0x529   : > { %v1522_v58 = vpop.f32.mrf.mxu1  ;;  %2387 = vmatprep.mubr.msk.bf16.mxu1 %vm2599_vm2, %v2598_v10  ;;  %2372 = vmatpush3.bf16.msra.mxu1 %v2480_v29 }
 0x52a   : > { %2373 = vmatprep.subr.bf16.mxu1 %v2598_v10 }
 0x52b   : > { %v2350_v59 = vpop.f32.mrf.mxu1 }
 0x52d   : > { %2374 = vmatpush3.bf16.msra.mxu1 %v2481_v30 }
 0x52e   : > { %2375 = vmatprep.subr.bf16.mxu1 %v2598_v10 }
 0x531   : > { %2376 = vmatpush3.bf16.msra.mxu1 %v2482_v31 }
 0x532   : > { %2377 = vmatprep.subr.bf16.mxu1 %v2598_v10 }
 0x535   : > { %2378 = vmatpush3.bf16.msra.mxu1 %v2483_v32 }
 0x536   : > { %2379 = vmatprep.subr.bf16.mxu1 %v2598_v10 }
 0x539   : > { %2380 = vmatpush3.bf16.msra.mxu1 %v2484_v33 }
 0x53a   : > { %2381 = vmatprep.subr.bf16.mxu1 %v2598_v10 }
 0x53d   : > { %2382 = vmatpush3.bf16.msra.mxu1 %v2485_v34 }
 0x53e   : > { %2383 = vmatprep.subr.bf16.mxu1 %v2598_v10 }
 0x541   : > { %2384 = vmatpush3.bf16.msra.mxu1 %v2486_v35 }
 0x542   : > { %2385 = vmatprep.subr.bf16.mxu1 %v2598_v10 }
 0x545   : > { %2386 = vmatpush3.bf16.msra.mxu1 %v2487_v36 }
 0x5e4   : > { %v1574_v60 = vpop.f32.mrf.mxu0 }
 0x5e5   : > { %v1629_v0 = vsel %vm890_vm1, %v1574_v60, 0.0 }
 0x5e6   : > { %v2355_v61 = vpop.f32.mrf.mxu0 }
 0x5e8   : > { %v1577_v62 = vpop.f32.mrf.mxu0  ;;  %v1623_v63 = vpop.f32.mrf.mxu1 }
 0x5e9   : > { %v1630_v2 = vsel %vm890_vm1, %v1623_v63, 0.0 }
 0x5ea   : > { %v1631_v3 = vadd.f32 %v1630_v2, %v1629_v0  ;;  %v2356_v4 = vpop.f32.mrf.mxu0  ;;  %v2361_v5 = vpop.f32.mrf.mxu1 }
 0x5ec   : > { %v1632_v7 = vadd.f32 %v1631_v3, %v2863_v1  ;;  %v1626_v8 = vpop.f32.mrf.mxu1  ;;  %v2479_v1 = vld [vmem:[%s2845_s7] sm:$0xff]  }
 0x5ed   : > { %2366 = vmatpush3.bf16.msra.mxu0 %v2479_v1 }
 0x5ee   : > { %v2362_v9 = vpop.f32.mrf.mxu1  ;;  %v2975_v11 = vadd.f32 %v2208_v6, %v1632_v7 }
 0x5f0   : > { %v1643_v12 = vsel %vm890_vm1, %v2975_v11, 0.0 }
 0x5f1   : > { %1644 = vadd.xlane.f32.xlu0 %v1643_v12 }
 0x67a   : > { %v1645_v13 = vpop.xlane.xlu0 %1644 }
 0x67b   : > { %v1646_v14 = vmul.f32 0.03125, %v1645_v13 }
 0x67d   : > { %v1647_v15 = vsub.f32 %v2975_v11, %v1646_v14 }
 0x67f   : > { %v1648_v16 = vmul.f32 %v1647_v15, %v1647_v15 }
 0x681   : > { %v1649_v17 = vsel %vm890_vm1, %v1648_v16, 0.0 }
 0x682   : > { %1650 = vadd.xlane.f32.xlu1 %v1649_v17 }
 0x70b   : > { %v1651_v19 = vpop.xlane.xlu1 %1650 }
 0x70c   : > { %v1652_v20 = vmul.f32 0.03125, %v1651_v19 }
 0x70e   : > { %v1653_v21 = vadd.f32 1e-05, %v1652_v20 }
 0x710   : > { %2498 = vrsqrt.f32 %v1653_v21 }
 0x71d   : > { %v2499_v22 = vpop.eup %2498 }
 0x71e   : > { %v1655_v24 = vmul.f32 %v2499_v22, %v1647_v15 }
 0x720   : > { %v1662_v26 = vmul.f32 %v2209_v23, %v1655_v24 }
 0x722   : > { %v1669_v27 = vadd.f32 %v2210_v25, %v1662_v26 }
 0x724   : > { %v1670_v28 = vpack.c.bf16 %v1669_v27, %v1669_v27 }
 0x726   : > { %2368 = vmatmul.mubr.msk.bf16.vlgmr.msra.gmra.mxu0 %vm890_vm1, %v1670_v28 }
 0x7e6   : > { %v1731_v38 = vpop.f32.mrf.mxu0 }
 0x7e7   : > { %v1732_v39 = vadd.f32 %v2211_v37, %v1731_v38 }
 0x7e8   : > { %v2369_v40 = vpop.f32.mrf.mxu0 }
 0x7e9   : > { %v1738_v41 = vmul.f32 0.044715, %v1732_v39  ;;  %v1737_v10 = vmul.f32 0.5, %v1732_v39 }
 0x7ea   : > { %v1734_v42 = vpop.f32.mrf.mxu0 }
 0x7eb   : > { %v1739_v43 = vmul.f32 %v1738_v41, %v1732_v39 }
 0x7ec   : > { %v2370_v44 = vpop.f32.mrf.mxu0 }
 0x7ed   : > { %v1740_v45 = vmul.f32 %v1739_v43, %v1732_v39 }
 0x7ef   : > { %v1741_v46 = vadd.f32 %v1740_v45, %v1732_v39 }
 0x7f1   : > { %v1742_v47 = vmul.f32 0.7978846, %v1741_v46 }
 0x7f3   : > { %2500 = vtanh.f32 %v1742_v47 }
 0x800   : > { %v2501_v48 = vpop.eup %2500 }
 0x801   : > { %v1744_v49 = vadd.f32 1.0, %v2501_v48 }
 0x803   : > { %v1745_v50 = vmul.f32 %v1744_v49, %v1737_v10 }
 0x805   : > { %v1746_v51 = vpack.c.bf16 %v1745_v50, %v1745_v50 }
 0x807   : > { %2388 = vmatmul.mubr.bf16.vlgmr.msra.gmra.mxu1 %v1746_v51 }
 0x8c7   : > { %v1852_v53 = vpop.f32.mrf.mxu1 }
 0x8c8   : > { %v1853_v54 = vadd.f32 %v2215_v52, %v1852_v53 }
 0x8c9   : > { %v2389_v55 = vpop.f32.mrf.mxu1  ;;  %1863 = sbr.rel (%p2224_p1) target bundleno = 2565 (0xa05), region = 104 }
 0x8ca   : > { %v1858_v56 = vadd.f32 %v1853_v54, %v2975_v11 }
 0x8cb   : > { %v1855_v57 = vpop.f32.mrf.mxu1 }
 0x8cc   : > { %1859 = vst.msk [vmem:[#allocation2] sm:$0xff] %vm890_vm1, %v1858_v56 }
 0x8cd   : > { %v2390_v58 = vpop.f32.mrf.mxu1 }
 0x8ce   : > { %v1866_v59 = vsel %vm890_vm1, %v1858_v56, 0.0  ;;  %v2225_v6 = vld [vmem:[%s3176_s19] ss:$0 sm:$0xff]  ;;  %vm1894_vm7 = vcmask 257024  }
 0x8cf   : > { %1867 = vadd.xlane.f32.xlu0 %v1866_v59  ;;  %v2226_v8 = vld [vmem:[%s3177_s17] ss:$0 sm:$0xff] }
 0x958   : > { %v1868_v60 = vpop.xlane.xlu0 %1867 }
 0x959   : > { %v1869_v61 = vmul.f32 0.03125, %v1868_v60 }
 0x95b   : > { %v1870_v62 = vsub.f32 %v1858_v56, %v1869_v61 }
 0x95d   : > { %v1871_v63 = vmul.f32 %v1870_v62, %v1870_v62 }
 0x95f   : > { %v1872_v0 = vsel %vm890_vm1, %v1871_v63, 0.0 }
 0x960   : > { %1873 = vadd.xlane.f32.xlu0 %v1872_v0 }
 0x9e9   : > { %v1874_v2 = vpop.xlane.xlu0 %1873 }
 0x9ea   : > { %v1875_v3 = vmul.f32 0.03125, %v1874_v2 }
 0x9ec   : > { %v1876_v4 = vadd.f32 1e-05, %v1875_v3 }
 0x9ee   : > { %2502 = vrsqrt.f32 %v1876_v4 }
 0x9fb   : > { %v2503_v5 = vpop.eup %2502 }
 0x9fc   : > { %v1878_v7 = vmul.f32 %v2503_v5, %v1870_v62 }
 0x9fe   : > { %v1885_v9 = vmul.f32 %v2225_v6, %v1878_v7 }
 0xa00   : > { %v1892_v11 = vadd.f32 %v2226_v8, %v1885_v9 }
 0xa02   : > { %v1893_v12 = vpack.c.bf16 %v1892_v11, %v1892_v11 }
 0xa04   : > { %1895 = vst.msk [vmem:[%s811_s15] sm:$0xf] %vm1894_vm7, %v1893_v12 }
 0xa05 PF: > { %s3178_s26 = sld [smem:[#allocation10_spill]]  ;;  %s1910_s23 = sshll.u32 %s811_s15, 4  ;;  %s1911_s23 = int_to_ptr.vmem [resolvable:$true] %s1910_s23 }
 0xa06   : > { %s3179_s24 = sld [smem:[#allocation7_spill]]  ;;  %s2504_s6 = scalar_lea.vmem %s1911_s23, 64 }
 0xa07   : > { %s3181_s21 = sld [smem:[#allocation36_spill]]  ;;  %p2505_p2 = scmp.ne.s32.totalorder %s1911_s23, %s2504_s6 }
 0xa08   : > { %s2600_s20 = smov [#allocation3]  }
 0xa09   : > { %p2506_p4 = pnand %p2505_p2, %p2750_p3  ;;  %s2508_s7 = sshll.u32 %s2600_s20, 4  ;;  %s2509_s7 = int_to_ptr.vmem [resolvable:$false] %s2508_s7 }
 0xa0a   : > { %s2510_s18 = scalar_lea.vmem %s2509_s7, 128  ;;  %p2511_p6 = scmp.lt.s32.totalorder %s1911_s23, %s2509_s7 }
 0xa0b   : > { %s2228_s28 = sshll.u32 %s3178_s26, 6  ;;  %p2507_p5 = pneg %p2506_p4 }
 0xa0c   : > { %s3183_s5 = sand.u32 1, %s3179_s24   ;;  %p2512_p7 = scmp.lt.s32.totalorder %s2510_s18, %s2504_s6 }
 0xa0d   : > { %s3182_s25 = smov %s3181_s21  ;;  %s1908_s2 = scalar_lea.hbm %s3181_s21, %s2228_s28 }
 0xa0e   : > { %s1897_s1 = scalar_lea.sflag [#allocation4], %s3183_s5  ;;  %p2513_p8 = por %p2512_p7, %p2511_p6 }
 0xa10   : > { %p2514_p10 = pnand %p2513_p8, %p2507_p5 }
 0xa12   : > { %2517 = shalt.err (!%p2514_p10)
}
 0xa13   : > { %s2518_s11 = scalar_lea.hbm %s1908_s2, 64  ;;  %s2522_s8 = scalar_lea.hbm %s3182_s25, 128 }
 0xa14   : > { %p2519_p11 = scmp.ne.s32.totalorder %s1908_s2, %s2518_s11  ;;  %p2523_p0 = scmp.lt.s32.totalorder %s1908_s2, %s3182_s25 }
 0xa15   : > { %p2524_p1 = scmp.lt.s32.totalorder %s2522_s8, %s2518_s11 }
 0xa16   : > { %p2520_p12 = pnand %p2519_p11, %p2750_p3 }
 0xa17   : > { %p2525_p2 = por %p2524_p1, %p2523_p0 }
 0xa18   : > { %p2521_p13 = pneg %p2520_p12 }
 0xa1a   : > { %p2526_p4 = pnand %p2525_p2, %p2521_p13 }
 0xa1c   : > { %2529 = shalt.err (!%p2526_p4)
}
 0xa1d   : > { %2391 = dma.vmem_to_hbm [thread:$0]  (%p2750_p3), %s1911_s23, 64, %s1908_s2, %s1897_s1  }
 0xa1e PF: > { %s3184_s10 = sld [smem:[#allocation13_spill]] }
 0xa1f   : > { %s3185_s0 = sld [smem:[#allocation6_spill]] }
 0xa24   : > { %p2397_p5 = scmp.ge.s32.totalorder %s3184_s10, 2 }
 0xa25   : > { %s1922_s3 = sand.u32 1, %s3185_s0  }
 0xa26   : > { %p2394_p6 = pnand %p2397_p5, %p2760_p9  ;;  %s1923_s27 = scalar_lea.sflag [#allocation4], %s1922_s3 }
 0xa28   : > { %p2395_p7 = pneg %p2394_p6 }
 0xa2a   : > { %2563 = dma.done.wait (%p2395_p7), %s1923_s27, 64  }
 0xa2b   : > { %2565 = vsyncadd (%p2395_p7), %s1923_s27, 4294967232  ;;  %s32_s23 = sadd.s32 1, %s3184_s10   ;;  %s3187_s0 = sld [smem:[#allocation7_spill]] }
 0xa2c   : > { %p29_p8 = scmp.ge.s32.totalorder %s32_s23, 6   ;;  %s3188_s30 = sld [smem:[#allocation8_spill]] }
 0xa2d   : > { %s3189_s20 = sld [smem:[#allocation18_spill]] }
 0xa2e   : > { %s3190_s21 = sld [smem:[#allocation11_spill]]  ;;  %31 = sbr.rel (!%p29_p8) target bundleno = 23 (0x17), region = 187 }
 0xa2f   : > { %s3191_s1 = sld [smem:[#allocation12_spill]] }
 0xa30   : > { %s3192_s22 = sld [smem:[#allocation14_spill]] }
 0xa31   : > { %s3193_s2 = sld [smem:[#allocation16_spill]] }
 0xa33   :  { %1928 = vsyncpa [#allocation4], 1 }
 0xa34   :  { %1930 = vsyncpa [#allocation4 + $0x1], 1 }

</bundles_post_ra>
